<compile_context>
chip_gen: v7x
topology: tpu7x:2x2x1
jax: 0.10.0
libtpu: 0.0.40
codegen_flags: <defaults>
</compile_context>

<pallas_src>
import numpy as np
import jax
import jax.numpy as jnp
from jax.experimental import pallas as pl
from jax.experimental.pallas import tpu as pltpu

LANE = 128  # vreg lane width — all channel dims are padded to a multiple


# ---------------------------------------------------------------------------
# Host-side helpers: padding + causal-shift matrices
# ---------------------------------------------------------------------------
def _rup(n, m=LANE):
    """Round n up to a multiple of m (at least m)."""
    return max(m, ((n + m - 1) // m) * m)


def _pad2d(w):
    r, c = w.shape
    return jnp.pad(w, ((0, _rup(r) - r), (0, _rup(c) - c)))


def _pad_bias(b):
    return jnp.pad(b, ((0, 0), (0, _rup(b.shape[1]) - b.shape[1])))


def _shift_matrix(S, d):
    """(S, S) matrix M with (M @ h)[t] = h[t - d] for t >= d, else 0 (causal)."""
    t = np.arange(S)
    m = ((t[:, None] - t[None, :]) == d) & (t[:, None] >= d)
    return jnp.asarray(m, dtype=jnp.float32)


# ---------------------------------------------------------------------------
# Fused forward kernel (one grid point = one batch element, (S, lane) slabs)
# ---------------------------------------------------------------------------
def make_fused_kernel(has_down, use_bf16=False):
    """has_down: tuple[bool] per TCN level (whether a 1x1 downsample exists)."""

    def cast(a):
        return a.astype(jnp.bfloat16) if use_bf16 else a

    def mm(a, b):
        return jnp.dot(cast(a), cast(b), preferred_element_type=jnp.float32)

    def kernel(*refs):
        it = iter(refs)
        x_ref = next(it)                      # (1, S, P_in)
        w_in = next(it)[...]                  # (P_in, P_d)
        b_in = next(it)[...]                  # (1, P_d)

        # linear_in; rows = time steps of this batch element
        h = mm(x_ref[0], w_in) + b_in         # (S, P_d)

        # TemporalConvNet: causal dilated convs + ReLU + residual, all in VMEM
        for hd in has_down:
            smat = next(it)[...]              # (S, S) causal shift, dilation d
            w1a = next(it)[...]; w1b = next(it)[...]; b1 = next(it)[...]
            w2a = next(it)[...]; w2b = next(it)[...]; b2 = next(it)[...]
            if hd:
                wd = next(it)[...]; bd = next(it)[...]

            # conv1: Conv1d(k=2, dilation=d, pad=d) + Chomp1d(d) + ReLU
            h1 = jnp.maximum(mm(h, w1b) + mm(mm(smat, h), w1a) + b1, 0.0)
            # conv2 (same dilation) + ReLU       (dropout = identity, inference)
            h2 = jnp.maximum(mm(h1, w2b) + mm(mm(smat, h1), w2a) + b2, 0.0)
            # residual (+ optional 1x1 downsample) + final ReLU
            res = (mm(h, wd) + bd) if hd else h
            h = jnp.maximum(h2 + res, 0.0)

        w_out = next(it)[...]
        b_out = next(it)[...]
        o_ref = next(it)
        # Final linear.  S rows fit in a single vreg column here, so computing
        # all rows is free on the MXU; the wrapper keeps only the last step.
        o_ref[0] = (mm(h, w_out) + b_out).astype(o_ref.dtype)

    return kernel


# ---------------------------------------------------------------------------
# Wrapper: host-side layout glue + the single pallas_call
# ---------------------------------------------------------------------------
def tcn_model_forward(x, params, use_bf16_matmul=False):
    S, B, F = x.shape
    output_size = params['w_out'].shape[1]
    p_in = _rup(F)
    p_out = _rup(output_size)

    # (S, B, F) -> (B, S, F) -> lane-pad to (B, S, p_in).  Tiny one-time glue.
    x_pad = jnp.pad(jnp.transpose(x, (1, 0, 2)),
                    ((0, 0), (0, 0), (0, p_in - F)))

    inputs = [x_pad, _pad2d(params['w_in']), _pad_bias(params['b_in'])]
    has_down = []
    for p in params['blocks']:
        has_down.append('wd' in p)
        inputs += [_shift_matrix(S, p['dilation']),
                   _pad2d(p['w1a']), _pad2d(p['w1b']), _pad_bias(p['b1']),
                   _pad2d(p['w2a']), _pad2d(p['w2b']), _pad_bias(p['b2'])]
        if 'wd' in p:
            inputs += [_pad2d(p['wd']), _pad_bias(p['bd'])]
    inputs += [_pad2d(params['w_out']), _pad_bias(params['b_out'])]

    def spec_for(a):
        if a.ndim == 3:   # the (B, S, p_in) activation input: one batch / step
            return pl.BlockSpec((1, S, a.shape[-1]), lambda b: (b, 0, 0))
        # weights / biases / shift matrices: full block, grid-invariant
        # (index_map constant across the grid -> DMA'd once, stay resident)
        return pl.BlockSpec(a.shape, lambda b: (0,) * a.ndim)

    out = pl.pallas_call(
        make_fused_kernel(tuple(has_down), use_bf16_matmul),
        out_shape=jax.ShapeDtypeStruct((B, S, p_out), jnp.float32),
        grid=(B,),
        in_specs=[spec_for(a) for a in inputs],
        out_specs=pl.BlockSpec((1, S, p_out), lambda b: (b, 0, 0)),
        # All weights total well under 1 MiB even double-buffered, so the
        # default scoped-VMEM limit is plenty on v5e/v6e/v7x.
        compiler_params=pltpu.CompilerParams(
            dimension_semantics=("parallel",)),
    )(*inputs)

    # tcn(x)[:, :, -1] -> linear : last time step, un-padded output columns
    return out[:, S - 1, :output_size]


# ---------------------------------------------------------------------------
# Parameter init (deterministic, synthetic — matches PyTorch init *schemes*:
# conv weights ~ N(0, 0.01), linear/conv biases ~ U(-1/sqrt(fan_in), ...))
# ---------------------------------------------------------------------------
def init_params(key, input_size, d_model, output_size, num_channels,
                kernel_size=2):
    n_keys = 8 + 8 * len(num_channels)
    keys = iter(jax.random.split(key, n_keys))

    def uniform(k, shape, bound):
        return jax.random.uniform(k, shape, jnp.float32, -bound, bound)

    params = {}
    b_in = 1.0 / np.sqrt(input_size)
    params['w_in'] = uniform(next(keys), (input_size, d_model), b_in)
    params['b_in'] = uniform(next(keys), (1, d_model), b_in)

    blocks = []
    for i, out_ch in enumerate(num_channels):
        in_ch = d_model if i == 0 else num_channels[i - 1]
        p = {'dilation': 2 ** i}
        # PyTorch Conv1d weight layout (Cout, Cin, K) with K = kernel_size = 2
        w1 = 0.01 * jax.random.normal(next(keys), (out_ch, in_ch, kernel_size),
                                      jnp.float32)
        w2 = 0.01 * jax.random.normal(next(keys), (out_ch, out_ch, kernel_size),
                                      jnp.float32)
        p['w1a'] = jnp.transpose(w1[:, :, 0])   # tap at t - d   -> (Cin, Cout)
        p['w1b'] = jnp.transpose(w1[:, :, 1])   # tap at t
        p['b1'] = uniform(next(keys), (1, out_ch),
                          1.0 / np.sqrt(in_ch * kernel_size))
        p['w2a'] = jnp.transpose(w2[:, :, 0])
        p['w2b'] = jnp.transpose(w2[:, :, 1])
        p['b2'] = uniform(next(keys), (1, out_ch),
                          1.0 / np.sqrt(out_ch * kernel_size))
        if in_ch != out_ch:  # downsample = Conv1d(in_ch, out_ch, 1)
            wd = 0.01 * jax.random.normal(next(keys), (out_ch, in_ch),
                                          jnp.float32)
            p['wd'] = jnp.transpose(wd)
            p['bd'] = uniform(next(keys), (1, out_ch), 1.0 / np.sqrt(in_ch))
        blocks.append(p)
    params['blocks'] = blocks

    b_out = 1.0 / np.sqrt(num_channels[-1])
    params['w_out'] = uniform(next(keys), (num_channels[-1], output_size), b_out)
    params['b_out'] = uniform(next(keys), (1, output_size), b_out)
    return params


# ---------------------------------------------------------------------------
# Pure-JAX reference of identical math (for correctness check)
# ---------------------------------------------------------------------------
def reference_forward(x, params):
    S, B, F = x.shape
    h = x.reshape(S * B, F) @ params['w_in'] + params['b_in']
    h = h.reshape(S, B, -1).transpose(1, 0, 2)          # (B, S, C)
    for p in params['blocks']:
        Bb, Ss, _ = h.shape
        d = p['dilation']

        def cconv(inp, wa, wb, b):
            shifted = jnp.concatenate(
                [jnp.zeros((Bb, d, inp.shape[-1])), inp[:, :Ss - d, :]], axis=1)
            return inp @ wb + shifted @ wa + b

        h1 = jax.nn.relu(cconv(h, p['w1a'], p['w1b'], p['b1']))
        h2 = jax.nn.relu(cconv(h1, p['w2a'], p['w2b'], p['b2']))
        res = h @ p['wd'] + p['bd'] if 'wd' in p else h
        h = jax.nn.relu(h2 + res)
    return h[:, -1, :] @ params['w_out'] + params['b_out']


if __name__ == "__main__":
    input_size, d_model, output_size = 4, 32, 3
    num_channels = [16, 32]           # both levels exercise the 1x1 downsample
    S, B = 8, 2                       # (seq_len, batch)

    key = jax.random.PRNGKey(0)
    kx, kp = jax.random.split(key)
    x = jax.random.normal(kx, (S, B, input_size), jnp.float32)
    params = init_params(kp, input_size, d_model, output_size, num_channels)

    out = tcn_model_forward(x, params)
    out = jax.block_until_ready(out)
    assert out.shape == (B, output_size)

    ref = reference_forward(x, params)
    np.testing.assert_allclose(np.asarray(out), np.asarray(ref),
                               rtol=1e-5, atol=1e-5)
    print("KERNEL_OK")
</pallas_src>

<mosaic_0001>
module attributes {stable_mosaic.version = 11 : i64} {
  func.func @kernel(%arg0: i32, %arg1: memref<1x8x128xf32, #tpu.memory_space<vmem>>, %arg2: memref<128x128xf32, #tpu.memory_space<vmem>>, %arg3: memref<1x128xf32, #tpu.memory_space<vmem>>, %arg4: memref<8x8xf32, #tpu.memory_space<vmem>>, %arg5: memref<128x128xf32, #tpu.memory_space<vmem>>, %arg6: memref<128x128xf32, #tpu.memory_space<vmem>>, %arg7: memref<1x128xf32, #tpu.memory_space<vmem>>, %arg8: memref<128x128xf32, #tpu.memory_space<vmem>>, %arg9: memref<128x128xf32, #tpu.memory_space<vmem>>, %arg10: memref<1x128xf32, #tpu.memory_space<vmem>>, %arg11: memref<128x128xf32, #tpu.memory_space<vmem>>, %arg12: memref<1x128xf32, #tpu.memory_space<vmem>>, %arg13: memref<8x8xf32, #tpu.memory_space<vmem>>, %arg14: memref<128x128xf32, #tpu.memory_space<vmem>>, %arg15: memref<128x128xf32, #tpu.memory_space<vmem>>, %arg16: memref<1x128xf32, #tpu.memory_space<vmem>>, %arg17: memref<128x128xf32, #tpu.memory_space<vmem>>, %arg18: memref<128x128xf32, #tpu.memory_space<vmem>>, %arg19: memref<1x128xf32, #tpu.memory_space<vmem>>, %arg20: memref<128x128xf32, #tpu.memory_space<vmem>>, %arg21: memref<1x128xf32, #tpu.memory_space<vmem>>, %arg22: memref<128x128xf32, #tpu.memory_space<vmem>>, %arg23: memref<1x128xf32, #tpu.memory_space<vmem>>, %arg24: memref<1x8x128xf32, #tpu.memory_space<vmem>>) attributes {dimension_semantics = [#tpu.dimension_semantics<parallel>], iteration_bounds = array<i64: 2>, scalar_prefetch = 0 : i64, scratch_operands = 0 : i64, tpu.core_type = #tpu.core_type<tc>, window_params = [{transform_indices = @transform_0, window_bounds = array<i64: 1, 8, 128>}, {pipeline_mode = #tpu.pipeline_mode<synchronous>, transform_indices = @transform_1, window_bounds = array<i64: 128, 128>}, {pipeline_mode = #tpu.pipeline_mode<synchronous>, transform_indices = @transform_2, window_bounds = array<i64: 1, 128>}, {pipeline_mode = #tpu.pipeline_mode<synchronous>, transform_indices = @transform_3, window_bounds = array<i64: 8, 8>}, {pipeline_mode = #tpu.pipeline_mode<synchronous>, transform_indices = @transform_4, window_bounds = array<i64: 128, 128>}, {pipeline_mode = #tpu.pipeline_mode<synchronous>, transform_indices = @transform_5, window_bounds = array<i64: 128, 128>}, {pipeline_mode = #tpu.pipeline_mode<synchronous>, transform_indices = @transform_6, window_bounds = array<i64: 1, 128>}, {pipeline_mode = #tpu.pipeline_mode<synchronous>, transform_indices = @transform_7, window_bounds = array<i64: 128, 128>}, {pipeline_mode = #tpu.pipeline_mode<synchronous>, transform_indices = @transform_8, window_bounds = array<i64: 128, 128>}, {pipeline_mode = #tpu.pipeline_mode<synchronous>, transform_indices = @transform_9, window_bounds = array<i64: 1, 128>}, {pipeline_mode = #tpu.pipeline_mode<synchronous>, transform_indices = @transform_10, window_bounds = array<i64: 128, 128>}, {pipeline_mode = #tpu.pipeline_mode<synchronous>, transform_indices = @transform_11, window_bounds = array<i64: 1, 128>}, {pipeline_mode = #tpu.pipeline_mode<synchronous>, transform_indices = @transform_12, window_bounds = array<i64: 8, 8>}, {pipeline_mode = #tpu.pipeline_mode<synchronous>, transform_indices = @transform_13, window_bounds = array<i64: 128, 128>}, {pipeline_mode = #tpu.pipeline_mode<synchronous>, transform_indices = @transform_14, window_bounds = array<i64: 128, 128>}, {pipeline_mode = #tpu.pipeline_mode<synchronous>, transform_indices = @transform_15, window_bounds = array<i64: 1, 128>}, {pipeline_mode = #tpu.pipeline_mode<synchronous>, transform_indices = @transform_16, window_bounds = array<i64: 128, 128>}, {pipeline_mode = #tpu.pipeline_mode<synchronous>, transform_indices = @transform_17, window_bounds = array<i64: 128, 128>}, {pipeline_mode = #tpu.pipeline_mode<synchronous>, transform_indices = @transform_18, window_bounds = array<i64: 1, 128>}, {pipeline_mode = #tpu.pipeline_mode<synchronous>, transform_indices = @transform_19, window_bounds = array<i64: 128, 128>}, {pipeline_mode = #tpu.pipeline_mode<synchronous>, transform_indices = @transform_20, window_bounds = array<i64: 1, 128>}, {pipeline_mode = #tpu.pipeline_mode<synchronous>, transform_indices = @transform_21, window_bounds = array<i64: 128, 128>}, {pipeline_mode = #tpu.pipeline_mode<synchronous>, transform_indices = @transform_22, window_bounds = array<i64: 1, 128>}, {transform_indices = @transform_23, window_bounds = array<i64: 1, 8, 128>}]} {
    %c0 = arith.constant 0 : index
    %c0_0 = arith.constant 0 : index
    %0 = vector.load %arg2[%c0, %c0_0] : memref<128x128xf32, #tpu.memory_space<vmem>>, vector<128x128xf32>
    %c0_1 = arith.constant 0 : index
    %c0_2 = arith.constant 0 : index
    %1 = vector.load %arg3[%c0_1, %c0_2] : memref<1x128xf32, #tpu.memory_space<vmem>>, vector<1x128xf32>
    %c0_3 = arith.constant 0 : index
    %c0_4 = arith.constant 0 : index
    %c0_5 = arith.constant 0 : index
    %2 = vector.load %arg1[%c0_3, %c0_4, %c0_5] : memref<1x8x128xf32, #tpu.memory_space<vmem>>, vector<1x8x128xf32>
    %3 = vector.shape_cast %2 : vector<1x8x128xf32> to vector<8x128xf32>
    %cst = arith.constant dense<0.000000e+00> : vector<8x128xf32>
    %4 = tpu.matmul %3, %0, %cst {dimension_numbers = #tpu.dot_dimension_numbers<[1], [0], [0], [1], [0, 0, 1, 1], [], []>} : vector<8x128xf32>, vector<128x128xf32>, vector<8x128xf32> -> vector<8x128xf32>
    %5 = vector.broadcast %1 : vector<1x128xf32> to vector<8x128xf32>
    %6 = arith.addf %4, %5 : vector<8x128xf32>
    %c0_6 = arith.constant 0 : index
    %c0_7 = arith.constant 0 : index
    %7 = vector.load %arg4[%c0_6, %c0_7] : memref<8x8xf32, #tpu.memory_space<vmem>>, vector<8x8xf32>
    %c0_8 = arith.constant 0 : index
    %c0_9 = arith.constant 0 : index
    %8 = vector.load %arg5[%c0_8, %c0_9] : memref<128x128xf32, #tpu.memory_space<vmem>>, vector<128x128xf32>
    %c0_10 = arith.constant 0 : index
    %c0_11 = arith.constant 0 : index
    %9 = vector.load %arg6[%c0_10, %c0_11] : memref<128x128xf32, #tpu.memory_space<vmem>>, vector<128x128xf32>
    %c0_12 = arith.constant 0 : index
    %c0_13 = arith.constant 0 : index
    %10 = vector.load %arg7[%c0_12, %c0_13] : memref<1x128xf32, #tpu.memory_space<vmem>>, vector<1x128xf32>
    %c0_14 = arith.constant 0 : index
    %c0_15 = arith.constant 0 : index
    %11 = vector.load %arg8[%c0_14, %c0_15] : memref<128x128xf32, #tpu.memory_space<vmem>>, vector<128x128xf32>
    %c0_16 = arith.constant 0 : index
    %c0_17 = arith.constant 0 : index
    %12 = vector.load %arg9[%c0_16, %c0_17] : memref<128x128xf32, #tpu.memory_space<vmem>>, vector<128x128xf32>
    %c0_18 = arith.constant 0 : index
    %c0_19 = arith.constant 0 : index
    %13 = vector.load %arg10[%c0_18, %c0_19] : memref<1x128xf32, #tpu.memory_space<vmem>>, vector<1x128xf32>
    %c0_20 = arith.constant 0 : index
    %c0_21 = arith.constant 0 : index
    %14 = vector.load %arg11[%c0_20, %c0_21] : memref<128x128xf32, #tpu.memory_space<vmem>>, vector<128x128xf32>
    %c0_22 = arith.constant 0 : index
    %c0_23 = arith.constant 0 : index
    %15 = vector.load %arg12[%c0_22, %c0_23] : memref<1x128xf32, #tpu.memory_space<vmem>>, vector<1x128xf32>
    %cst_24 = arith.constant dense<0.000000e+00> : vector<8x128xf32>
    %16 = tpu.matmul %6, %9, %cst_24 {dimension_numbers = #tpu.dot_dimension_numbers<[1], [0], [0], [1], [0, 0, 1, 1], [], []>} : vector<8x128xf32>, vector<128x128xf32>, vector<8x128xf32> -> vector<8x128xf32>
    %cst_25 = arith.constant dense<0.000000e+00> : vector<8x128xf32>
    %17 = tpu.matmul %7, %6, %cst_25 {dimension_numbers = #tpu.dot_dimension_numbers<[1], [0], [0], [1], [0, 0, 1, 1], [], []>} : vector<8x8xf32>, vector<8x128xf32>, vector<8x128xf32> -> vector<8x128xf32>
    %cst_26 = arith.constant dense<0.000000e+00> : vector<8x128xf32>
    %18 = tpu.matmul %17, %8, %cst_26 {dimension_numbers = #tpu.dot_dimension_numbers<[1], [0], [0], [1], [0, 0, 1, 1], [], []>} : vector<8x128xf32>, vector<128x128xf32>, vector<8x128xf32> -> vector<8x128xf32>
    %19 = arith.addf %16, %18 : vector<8x128xf32>
    %20 = vector.broadcast %10 : vector<1x128xf32> to vector<8x128xf32>
    %21 = arith.addf %19, %20 : vector<8x128xf32>
    %cst_27 = arith.constant 0.000000e+00 : f32
    %22 = vector.broadcast %cst_27 : f32 to vector<8x128xf32>
    %23 = arith.maximumf %21, %22 : vector<8x128xf32>
    %cst_28 = arith.constant dense<0.000000e+00> : vector<8x128xf32>
    %24 = tpu.matmul %23, %12, %cst_28 {dimension_numbers = #tpu.dot_dimension_numbers<[1], [0], [0], [1], [0, 0, 1, 1], [], []>} : vector<8x128xf32>, vector<128x128xf32>, vector<8x128xf32> -> vector<8x128xf32>
    %cst_29 = arith.constant dense<0.000000e+00> : vector<8x128xf32>
    %25 = tpu.matmul %7, %23, %cst_29 {dimension_numbers = #tpu.dot_dimension_numbers<[1], [0], [0], [1], [0, 0, 1, 1], [], []>} : vector<8x8xf32>, vector<8x128xf32>, vector<8x128xf32> -> vector<8x128xf32>
    %cst_30 = arith.constant dense<0.000000e+00> : vector<8x128xf32>
    %26 = tpu.matmul %25, %11, %cst_30 {dimension_numbers = #tpu.dot_dimension_numbers<[1], [0], [0], [1], [0, 0, 1, 1], [], []>} : vector<8x128xf32>, vector<128x128xf32>, vector<8x128xf32> -> vector<8x128xf32>
    %27 = arith.addf %24, %26 : vector<8x128xf32>
    %28 = vector.broadcast %13 : vector<1x128xf32> to vector<8x128xf32>
    %29 = arith.addf %27, %28 : vector<8x128xf32>
    %cst_31 = arith.constant 0.000000e+00 : f32
    %30 = vector.broadcast %cst_31 : f32 to vector<8x128xf32>
    %31 = arith.maximumf %29, %30 : vector<8x128xf32>
    %cst_32 = arith.constant dense<0.000000e+00> : vector<8x128xf32>
    %32 = tpu.matmul %6, %14, %cst_32 {dimension_numbers = #tpu.dot_dimension_numbers<[1], [0], [0], [1], [0, 0, 1, 1], [], []>} : vector<8x128xf32>, vector<128x128xf32>, vector<8x128xf32> -> vector<8x128xf32>
    %33 = vector.broadcast %15 : vector<1x128xf32> to vector<8x128xf32>
    %34 = arith.addf %32, %33 : vector<8x128xf32>
    %35 = arith.addf %31, %34 : vector<8x128xf32>
    %cst_33 = arith.constant 0.000000e+00 : f32
    %36 = vector.broadcast %cst_33 : f32 to vector<8x128xf32>
    %37 = arith.maximumf %35, %36 : vector<8x128xf32>
    %c0_34 = arith.constant 0 : index
    %c0_35 = arith.constant 0 : index
    %38 = vector.load %arg13[%c0_34, %c0_35] : memref<8x8xf32, #tpu.memory_space<vmem>>, vector<8x8xf32>
    %c0_36 = arith.constant 0 : index
    %c0_37 = arith.constant 0 : index
    %39 = vector.load %arg14[%c0_36, %c0_37] : memref<128x128xf32, #tpu.memory_space<vmem>>, vector<128x128xf32>
    %c0_38 = arith.constant 0 : index
    %c0_39 = arith.constant 0 : index
    %40 = vector.load %arg15[%c0_38, %c0_39] : memref<128x128xf32, #tpu.memory_space<vmem>>, vector<128x128xf32>
    %c0_40 = arith.constant 0 : index
    %c0_41 = arith.constant 0 : index
    %41 = vector.load %arg16[%c0_40, %c0_41] : memref<1x128xf32, #tpu.memory_space<vmem>>, vector<1x128xf32>
    %c0_42 = arith.constant 0 : index
    %c0_43 = arith.constant 0 : index
    %42 = vector.load %arg17[%c0_42, %c0_43] : memref<128x128xf32, #tpu.memory_space<vmem>>, vector<128x128xf32>
    %c0_44 = arith.constant 0 : index
    %c0_45 = arith.constant 0 : index
    %43 = vector.load %arg18[%c0_44, %c0_45] : memref<128x128xf32, #tpu.memory_space<vmem>>, vector<128x128xf32>
    %c0_46 = arith.constant 0 : index
    %c0_47 = arith.constant 0 : index
    %44 = vector.load %arg19[%c0_46, %c0_47] : memref<1x128xf32, #tpu.memory_space<vmem>>, vector<1x128xf32>
    %c0_48 = arith.constant 0 : index
    %c0_49 = arith.constant 0 : index
    %45 = vector.load %arg20[%c0_48, %c0_49] : memref<128x128xf32, #tpu.memory_space<vmem>>, vector<128x128xf32>
    %c0_50 = arith.constant 0 : index
    %c0_51 = arith.constant 0 : index
    %46 = vector.load %arg21[%c0_50, %c0_51] : memref<1x128xf32, #tpu.memory_space<vmem>>, vector<1x128xf32>
    %cst_52 = arith.constant dense<0.000000e+00> : vector<8x128xf32>
    %47 = tpu.matmul %37, %40, %cst_52 {dimension_numbers = #tpu.dot_dimension_numbers<[1], [0], [0], [1], [0, 0, 1, 1], [], []>} : vector<8x128xf32>, vector<128x128xf32>, vector<8x128xf32> -> vector<8x128xf32>
    %cst_53 = arith.constant dense<0.000000e+00> : vector<8x128xf32>
    %48 = tpu.matmul %38, %37, %cst_53 {dimension_numbers = #tpu.dot_dimension_numbers<[1], [0], [0], [1], [0, 0, 1, 1], [], []>} : vector<8x8xf32>, vector<8x128xf32>, vector<8x128xf32> -> vector<8x128xf32>
    %cst_54 = arith.constant dense<0.000000e+00> : vector<8x128xf32>
    %49 = tpu.matmul %48, %39, %cst_54 {dimension_numbers = #tpu.dot_dimension_numbers<[1], [0], [0], [1], [0, 0, 1, 1], [], []>} : vector<8x128xf32>, vector<128x128xf32>, vector<8x128xf32> -> vector<8x128xf32>
    %50 = arith.addf %47, %49 : vector<8x128xf32>
    %51 = vector.broadcast %41 : vector<1x128xf32> to vector<8x128xf32>
    %52 = arith.addf %50, %51 : vector<8x128xf32>
    %cst_55 = arith.constant 0.000000e+00 : f32
    %53 = vector.broadcast %cst_55 : f32 to vector<8x128xf32>
    %54 = arith.maximumf %52, %53 : vector<8x128xf32>
    %cst_56 = arith.constant dense<0.000000e+00> : vector<8x128xf32>
    %55 = tpu.matmul %54, %43, %cst_56 {dimension_numbers = #tpu.dot_dimension_numbers<[1], [0], [0], [1], [0, 0, 1, 1], [], []>} : vector<8x128xf32>, vector<128x128xf32>, vector<8x128xf32> -> vector<8x128xf32>
    %cst_57 = arith.constant dense<0.000000e+00> : vector<8x128xf32>
    %56 = tpu.matmul %38, %54, %cst_57 {dimension_numbers = #tpu.dot_dimension_numbers<[1], [0], [0], [1], [0, 0, 1, 1], [], []>} : vector<8x8xf32>, vector<8x128xf32>, vector<8x128xf32> -> vector<8x128xf32>
    %cst_58 = arith.constant dense<0.000000e+00> : vector<8x128xf32>
    %57 = tpu.matmul %56, %42, %cst_58 {dimension_numbers = #tpu.dot_dimension_numbers<[1], [0], [0], [1], [0, 0, 1, 1], [], []>} : vector<8x128xf32>, vector<128x128xf32>, vector<8x128xf32> -> vector<8x128xf32>
    %58 = arith.addf %55, %57 : vector<8x128xf32>
    %59 = vector.broadcast %44 : vector<1x128xf32> to vector<8x128xf32>
    %60 = arith.addf %58, %59 : vector<8x128xf32>
    %cst_59 = arith.constant 0.000000e+00 : f32
    %61 = vector.broadcast %cst_59 : f32 to vector<8x128xf32>
    %62 = arith.maximumf %60, %61 : vector<8x128xf32>
    %cst_60 = arith.constant dense<0.000000e+00> : vector<8x128xf32>
    %63 = tpu.matmul %37, %45, %cst_60 {dimension_numbers = #tpu.dot_dimension_numbers<[1], [0], [0], [1], [0, 0, 1, 1], [], []>} : vector<8x128xf32>, vector<128x128xf32>, vector<8x128xf32> -> vector<8x128xf32>
    %64 = vector.broadcast %46 : vector<1x128xf32> to vector<8x128xf32>
    %65 = arith.addf %63, %64 : vector<8x128xf32>
    %66 = arith.addf %62, %65 : vector<8x128xf32>
    %cst_61 = arith.constant 0.000000e+00 : f32
    %67 = vector.broadcast %cst_61 : f32 to vector<8x128xf32>
    %68 = arith.maximumf %66, %67 : vector<8x128xf32>
    %c0_62 = arith.constant 0 : index
    %c0_63 = arith.constant 0 : index
    %69 = vector.load %arg22[%c0_62, %c0_63] : memref<128x128xf32, #tpu.memory_space<vmem>>, vector<128x128xf32>
    %c0_64 = arith.constant 0 : index
    %c0_65 = arith.constant 0 : index
    %70 = vector.load %arg23[%c0_64, %c0_65] : memref<1x128xf32, #tpu.memory_space<vmem>>, vector<1x128xf32>
    %cst_66 = arith.constant dense<0.000000e+00> : vector<8x128xf32>
    %71 = tpu.matmul %68, %69, %cst_66 {dimension_numbers = #tpu.dot_dimension_numbers<[1], [0], [0], [1], [0, 0, 1, 1], [], []>} : vector<8x128xf32>, vector<128x128xf32>, vector<8x128xf32> -> vector<8x128xf32>
    %72 = vector.broadcast %70 : vector<1x128xf32> to vector<8x128xf32>
    %73 = arith.addf %71, %72 : vector<8x128xf32>
    %c0_67 = arith.constant 0 : index
    %c0_68 = arith.constant 0 : index
    %c0_69 = arith.constant 0 : index
    %74 = vector.load %arg24[%c0_67, %c0_68, %c0_69] : memref<1x8x128xf32, #tpu.memory_space<vmem>>, vector<1x8x128xf32>
    %75 = vector.shape_cast %74 : vector<1x8x128xf32> to vector<8x128xf32>
    %76 = vector.shape_cast %73 : vector<8x128xf32> to vector<1x8x128xf32>
    tpu.vector_store %arg24[%c0_67, %c0_68, %c0_69], %76 {strides = array<i32>} : memref<1x8x128xf32, #tpu.memory_space<vmem>>, vector<1x8x128xf32>,
    return
  }
  func.func @transform_0(%arg0: i32) -> (i32, i32, i32) {
    %c0_i32 = arith.constant 0 : i32
    %c0_i32_0 = arith.constant 0 : i32
    %c0_i32_1 = arith.constant 0 : i32
    return %arg0, %c0_i32, %c0_i32_0 : i32, i32, i32
  }
  func.func @transform_1(%arg0: i32) -> (i32, i32) {
    %c0_i32 = arith.constant 0 : i32
    %c0_i32_0 = arith.constant 0 : i32
    %c0_i32_1 = arith.constant 0 : i32
    return %c0_i32, %c0_i32_0 : i32, i32
  }
  func.func @transform_2(%arg0: i32) -> (i32, i32) {
    %c0_i32 = arith.constant 0 : i32
    %c0_i32_0 = arith.constant 0 : i32
    %c0_i32_1 = arith.constant 0 : i32
    return %c0_i32, %c0_i32_0 : i32, i32
  }
  func.func @transform_3(%arg0: i32) -> (i32, i32) {
    %c0_i32 = arith.constant 0 : i32
    %c0_i32_0 = arith.constant 0 : i32
    %c0_i32_1 = arith.constant 0 : i32
    return %c0_i32, %c0_i32_0 : i32, i32
  }
  func.func @transform_4(%arg0: i32) -> (i32, i32) {
    %c0_i32 = arith.constant 0 : i32
    %c0_i32_0 = arith.constant 0 : i32
    %c0_i32_1 = arith.constant 0 : i32
    return %c0_i32, %c0_i32_0 : i32, i32
  }
  func.func @transform_5(%arg0: i32) -> (i32, i32) {
    %c0_i32 = arith.constant 0 : i32
    %c0_i32_0 = arith.constant 0 : i32
    %c0_i32_1 = arith.constant 0 : i32
    return %c0_i32, %c0_i32_0 : i32, i32
  }
  func.func @transform_6(%arg0: i32) -> (i32, i32) {
    %c0_i32 = arith.constant 0 : i32
    %c0_i32_0 = arith.constant 0 : i32
    %c0_i32_1 = arith.constant 0 : i32
    return %c0_i32, %c0_i32_0 : i32, i32
  }
  func.func @transform_7(%arg0: i32) -> (i32, i32) {
    %c0_i32 = arith.constant 0 : i32
    %c0_i32_0 = arith.constant 0 : i32
    %c0_i32_1 = arith.constant 0 : i32
    return %c0_i32, %c0_i32_0 : i32, i32
  }
  func.func @transform_8(%arg0: i32) -> (i32, i32) {
    %c0_i32 = arith.constant 0 : i32
    %c0_i32_0 = arith.constant 0 : i32
    %c0_i32_1 = arith.constant 0 : i32
    return %c0_i32, %c0_i32_0 : i32, i32
  }
  func.func @transform_9(%arg0: i32) -> (i32, i32) {
    %c0_i32 = arith.constant 0 : i32
    %c0_i32_0 = arith.constant 0 : i32
    %c0_i32_1 = arith.constant 0 : i32
    return %c0_i32, %c0_i32_0 : i32, i32
  }
  func.func @transform_10(%arg0: i32) -> (i32, i32) {
    %c0_i32 = arith.constant 0 : i32
    %c0_i32_0 = arith.constant 0 : i32
    %c0_i32_1 = arith.constant 0 : i32
    return %c0_i32, %c0_i32_0 : i32, i32
  }
  func.func @transform_11(%arg0: i32) -> (i32, i32) {
    %c0_i32 = arith.constant 0 : i32
    %c0_i32_0 = arith.constant 0 : i32
    %c0_i32_1 = arith.constant 0 : i32
    return %c0_i32, %c0_i32_0 : i32, i32
  }
  func.func @transform_12(%arg0: i32) -> (i32, i32) {
    %c0_i32 = arith.constant 0 : i32
    %c0_i32_0 = arith.constant 0 : i32
    %c0_i32_1 = arith.constant 0 : i32
    return %c0_i32, %c0_i32_0 : i32, i32
  }
  func.func @transform_13(%arg0: i32) -> (i32, i32) {
    %c0_i32 = arith.constant 0 : i32
    %c0_i32_0 = arith.constant 0 : i32
    %c0_i32_1 = arith.constant 0 : i32
    return %c0_i32, %c0_i32_0 : i32, i32
  }
  func.func @transform_14(%arg0: i32) -> (i32, i32) {
    %c0_i32 = arith.constant 0 : i32
    %c0_i32_0 = arith.constant 0 : i32
    %c0_i32_1 = arith.constant 0 : i32
    return %c0_i32, %c0_i32_0 : i32, i32
  }
  func.func @transform_15(%arg0: i32) -> (i32, i32) {
    %c0_i32 = arith.constant 0 : i32
    %c0_i32_0 = arith.constant 0 : i32
    %c0_i32_1 = arith.constant 0 : i32
    return %c0_i32, %c0_i32_0 : i32, i32
  }
  func.func @transform_16(%arg0: i32) -> (i32, i32) {
    %c0_i32 = arith.constant 0 : i32
    %c0_i32_0 = arith.constant 0 : i32
    %c0_i32_1 = arith.constant 0 : i32
    return %c0_i32, %c0_i32_0 : i32, i32
  }
  func.func @transform_17(%arg0: i32) -> (i32, i32) {
    %c0_i32 = arith.constant 0 : i32
    %c0_i32_0 = arith.constant 0 : i32
    %c0_i32_1 = arith.constant 0 : i32
    return %c0_i32, %c0_i32_0 : i32, i32
  }
  func.func @transform_18(%arg0: i32) -> (i32, i32) {
    %c0_i32 = arith.constant 0 : i32
    %c0_i32_0 = arith.constant 0 : i32
    %c0_i32_1 = arith.constant 0 : i32
    return %c0_i32, %c0_i32_0 : i32, i32
  }
  func.func @transform_19(%arg0: i32) -> (i32, i32) {
    %c0_i32 = arith.constant 0 : i32
    %c0_i32_0 = arith.constant 0 : i32
    %c0_i32_1 = arith.constant 0 : i32
    return %c0_i32, %c0_i32_0 : i32, i32
  }
  func.func @transform_20(%arg0: i32) -> (i32, i32) {
    %c0_i32 = arith.constant 0 : i32
    %c0_i32_0 = arith.constant 0 : i32
    %c0_i32_1 = arith.constant 0 : i32
    return %c0_i32, %c0_i32_0 : i32, i32
  }
  func.func @transform_21(%arg0: i32) -> (i32, i32) {
    %c0_i32 = arith.constant 0 : i32
    %c0_i32_0 = arith.constant 0 : i32
    %c0_i32_1 = arith.constant 0 : i32
    return %c0_i32, %c0_i32_0 : i32, i32
  }
  func.func @transform_22(%arg0: i32) -> (i32, i32) {
    %c0_i32 = arith.constant 0 : i32
    %c0_i32_0 = arith.constant 0 : i32
    %c0_i32_1 = arith.constant 0 : i32
    return %c0_i32, %c0_i32_0 : i32, i32
  }
  func.func @transform_23(%arg0: i32) -> (i32, i32, i32) {
    %c0_i32 = arith.constant 0 : i32
    %c0_i32_0 = arith.constant 0 : i32
    %c0_i32_1 = arith.constant 0 : i32
    return %arg0, %c0_i32, %c0_i32_0 : i32, i32, i32
  }
}

</mosaic_0001>

<bundles_post_ra>
// kernel: tpu_custom_call.1
= control target key start
LH: loop header
LB: loop body
LE: loop exit
PB: predicated region body
PF: predicated region fallthrough
CT: control target
= control target key end

     0   :  { %s4916_s0 = inlined_call_operand.hbm [shape: f32[2,8,128], index: 0, kind: input, shape index: {}]   ;;  %s4917_s1 = inlined_call_operand.hbm [shape: f32[128,128], index: 1, kind: input, shape index: {}]   ;;  %s4918_s2 = inlined_call_operand.vmem [shape: f32[1,128], index: 2, kind: input, shape index: {}]   ;;  %s4919_s3 = inlined_call_operand.vmem [shape: f32[8,8], index: 3, kind: input, shape index: {}]   ;;  %s4920_s4 = inlined_call_operand.hbm [shape: f32[128,128], index: 4, kind: input, shape index: {}]   ;;  %s4921_s5 = inlined_call_operand.hbm [shape: f32[128,128], index: 5, kind: input, shape index: {}]   ;;  %s4922_s6 = inlined_call_operand.vmem [shape: f32[1,128], index: 6, kind: input, shape index: {}]   ;;  %s4923_s7 = inlined_call_operand.hbm [shape: f32[128,128], index: 7, kind: input, shape index: {}]   ;;  %s4924_s8 = inlined_call_operand.hbm [shape: f32[128,128], index: 8, kind: input, shape index: {}]   ;;  %s4925_s9 = inlined_call_operand.vmem [shape: f32[1,128], index: 9, kind: input, shape index: {}]   ;;  %s4926_s10 = inlined_call_operand.hbm [shape: f32[128,128], index: 10, kind: input, shape index: {}]   ;;  %s4927_s11 = inlined_call_operand.vmem [shape: f32[1,128], index: 11, kind: input, shape index: {}]   ;;  %s4928_s12 = inlined_call_operand.vmem [shape: f32[8,8], index: 12, kind: input, shape index: {}]   ;;  %s4929_s13 = inlined_call_operand.hbm [shape: f32[128,128], index: 13, kind: input, shape index: {}]   ;;  %s4930_s14 = inlined_call_operand.hbm [shape: f32[128,128], index: 14, kind: input, shape index: {}]   ;;  %s4931_s15 = inlined_call_operand.vmem [shape: f32[1,128], index: 15, kind: input, shape index: {}]   ;;  %s4932_s16 = inlined_call_operand.hbm [shape: f32[128,128], index: 16, kind: input, shape index: {}]   ;;  %s4933_s17 = inlined_call_operand.hbm [shape: f32[128,128], index: 17, kind: input, shape index: {}]   ;;  %s4934_s18 = inlined_call_operand.vmem [shape: f32[1,128], index: 18, kind: input, shape index: {}]   ;;  %s4935_s19 = inlined_call_operand.hbm [shape: f32[128,128], index: 19, kind: input, shape index: {}]   ;;  %s4936_s20 = inlined_call_operand.vmem [shape: f32[1,128], index: 20, kind: input, shape index: {}]   ;;  %s4937_s21 = inlined_call_operand.hbm [shape: f32[128,128], index: 21, kind: input, shape index: {}]   ;;  %s4938_s22 = inlined_call_operand.vmem [shape: f32[1,128], index: 22, kind: input, shape index: {}]   ;;  %s4939_s23 = inlined_call_operand.hbm [shape: f32[2,8,128], index: 23, kind: output, shape index: {}]  }
   0x1   :  { %4952 = sst [smem:[#allocation33_spill]] %s4916_s0 }
   0x2   :  { %4953 = sst [smem:[#allocation34_spill]] %s4917_s1 }
   0x3   :  { %4954 = sst [smem:[#allocation35_spill]] %s4918_s2 }
   0x4   :  { %4955 = sst [smem:[#allocation36_spill]] %s4919_s3 }
   0x5   :  { %4956 = sst [smem:[#allocation37_spill]] %s4920_s4 }
   0x6   :  { %4957 = sst [smem:[#allocation38_spill]] %s4921_s5 }
   0x7   :  { %4958 = sst [smem:[#allocation39_spill]] %s4922_s6 }
   0x8   :  { %4959 = sst [smem:[#allocation40_spill]] %s4923_s7 }
   0x9   :  { %4960 = sst [smem:[#allocation41_spill]] %s4924_s8 }
   0xa   :  { %4961 = sst [smem:[#allocation42_spill]] %s4925_s9 }
   0xb   :  { %4962 = sst [smem:[#allocation43_spill]] %s4927_s11 }
   0xc   :  { %4963 = sst [smem:[#allocation44_spill]] %s4928_s12 }
   0xd   :  { %4964 = sst [smem:[#allocation45_spill]] %s4929_s13 }
   0xe   :  { %4965 = sst [smem:[#allocation46_spill]] %s4931_s15 }
   0xf   :  { %4966 = sst [smem:[#allocation47_spill]] %s4934_s18 }
  0x10   :  { %4967 = sst [smem:[#allocation48_spill]] %s4936_s20 }
  0x11   :  { %4968 = sst [smem:[#allocation49_spill]] %s4938_s22 }
  0x12   :  { %4969 = sst [smem:[#allocation50_spill]] %s4939_s23 }
  0x13   :  { %28 = vsyncpa [#allocation3], 0 }
  0x14   :  { %30 = vsyncpa [#allocation3 + $0x1], 0 }
  0x15   :  { %31 = vsyncpa [#allocation6], 0 }
  0x16   :  { %32 = vsyncpa [#allocation9], 0 }
  0x17   :  { %33 = vsyncpa [#allocation12], 0 }
  0x18   :  { %34 = vsyncpa [#allocation15], 0 }
  0x19   :  { %35 = vsyncpa [#allocation18], 0 }
  0x1a   :  { %36 = vsyncpa [#allocation21], 0 }
  0x1b   :  { %37 = vsyncpa [#allocation4], 0 }
  0x1c   :  { %39 = vsyncpa [#allocation4 + $0x1], 0  ;;  %s4246_s4 = smov 0   ;;  %s4248_s30 = smov 0  }
  0x1d   :  { %s4250_s24 = smov 0   ;;  %s4252_s25 = smov 0  }
  0x1e LB: > { %s4107_s5 = smov [#allocation5]   ;;  %s4267_s26 = sadd.s32 4294967295, %s4105_s25   ;;  %s4105_s25 = sphi %s4252_s25, %s5018_s25   ;;  %s4101_s24 = sphi %s4250_s24, %s5017_s24   ;;  %s4097_s30 = sphi %s4248_s30, %s5016_s30   ;;  %s4093_s4 = sphi %s4246_s4, %s5015_s4  }
  0x1f   : > { %s576_s1 = sshll.u32 %s4107_s5, 4  ;;  %p2490_p0 = scmp.ge.s32.totalorder %s4105_s25, 1  ;;  %s4272_s1 = int_to_ptr.vmem [resolvable:$true] %s576_s1 }
  0x20   : > { %p4948_p1 = scmp.eq.s32.totalorder %s4267_s26, 0  ;;  %p564_p2 = scmp.lt.s32.totalorder %s4105_s25, 3 }
  0x21   : > { %s4108_s6 = smov [#allocation8]   ;;  %s4109_s28 = smov [#allocation11]  }
  0x22   : > { %p4274_p3 = pnand %p2490_p0, %p564_p2  ;;  %s608_s27 = sshll.u32 %s4108_s6, 4  ;;  %s4287_s27 = int_to_ptr.vmem [resolvable:$true] %s608_s27 }
  0x23   : > { %s637_s29 = sshll.u32 %s4109_s28, 4  ;;  %s4973_s5 = sld [smem:[#allocation34_spill]]  ;;  %s4289_s29 = int_to_ptr.vmem [resolvable:$true] %s637_s29 }
  0x24   : > { %s4970_s2 = scalar_select %p4274_p3, 1, 0 }
  0x25   : > { %p3529_p5 = pneg %p4274_p3 }
  0x26   : > { %4971 = sst [smem:[#allocation32_spill]] %s4970_s2 }
  0x27   : > { %p4283_p6 = pnand %p3529_p5, %p4948_p1 }
  0x29   : > { %s3649_s23 = scalar_lea.hbm %s4973_s5, 2048  ;;  %p4299_p8 = pneg %p4283_p6 }
  0x2a   : > { %p3650_p7 = scmp.ne.s32.totalorder %s4973_s5, %s3649_s23  ;;  %p3656_p11 = scmp.lt.u32.totalorder %s3649_s23, %s4973_s5 }
  0x2c   : > { %p3652_p9 = pnand %p4299_p8, %p3650_p7 }
  0x2e   : > { %p3653_p10 = pneg %p3652_p9 }
  0x30   : > { %p3658_p12 = pnand %p3656_p11, %p3653_p10 }
  0x32   : > { %3661 = shalt.err (!%p3658_p12)
}
  0x33   : > { %s3662_s20 = scalar_lea.vmem %s4272_s1, 2048  ;;  %p3670_p5 = scmp.lt.s32.totalorder %s4272_s1, %s4272_s1 }
  0x34   : > { %p3663_p13 = scmp.ne.s32.totalorder %s4272_s1, %s3662_s20  ;;  %p3671_p4 = scmp.lt.s32.totalorder %s3662_s20, %s3662_s20 }
  0x36   : > { %p3665_p0 = pnand %p3663_p13, %p4299_p8  ;;  %p3672_p7 = por %p3671_p4, %p3670_p5 }
  0x38   : > { %p3666_p2 = pneg %p3665_p0 }
  0x3a   : > { %p3673_p9 = pnand %p3672_p7, %p3666_p2 }
  0x3c   : > { %3676 = shalt.err (!%p3673_p9)
}
  0x3d   : > { %s4110_s22 = smov 128   ;;  %s4111_s18 = smov 8  }
  0x3e   : > { %3532 = dma.hbm_to_vmem [thread:$0]  (!%p4283_p6), %s4973_s5, 2048, %s4272_s1, [#allocation6], %s4110_s22, %s4110_s22, %s4111_s18  }
  0x3f   : > { %s4975_s15 = sld [smem:[#allocation38_spill]] }
  0x45   : > { %s3677_s20 = scalar_lea.hbm %s4975_s15, 2048 }
  0x46   : > { %p3678_p4 = scmp.ne.s32.totalorder %s4975_s15, %s3677_s20  ;;  %p3684_p12 = scmp.lt.u32.totalorder %s3677_s20, %s4975_s15 }
  0x48   : > { %p3680_p10 = pnand %p3678_p4, %p4299_p8 }
  0x4a   : > { %p3681_p11 = pneg %p3680_p10 }
  0x4c   : > { %p3686_p13 = pnand %p3684_p12, %p3681_p11 }
  0x4e   : > { %3689 = shalt.err (!%p3686_p13)
}
  0x4f   : > { %s3690_s1 = scalar_lea.vmem %s4287_s27, 2048  ;;  %p3698_p7 = scmp.lt.s32.totalorder %s4287_s27, %s4287_s27 }
  0x50   : > { %p3691_p0 = scmp.ne.s32.totalorder %s4287_s27, %s3690_s1  ;;  %p3699_p9 = scmp.lt.s32.totalorder %s3690_s1, %s3690_s1 }
  0x52   : > { %p3693_p2 = pnand %p3691_p0, %p4299_p8  ;;  %p3700_p4 = por %p3699_p9, %p3698_p7 }
  0x54   : > { %p3694_p5 = pneg %p3693_p2 }
  0x56   : > { %p3701_p10 = pnand %p3700_p4, %p3694_p5 }
  0x58   : > { %3704 = shalt.err (!%p3701_p10)
}
  0x59   : > { %3538 = dma.hbm_to_vmem [thread:$0]  (!%p4283_p6), %s4975_s15, 2048, %s4287_s27, [#allocation9], %s4110_s22, %s4110_s22, %s4111_s18  }
  0x5a   : > { %s4976_s8 = sld [smem:[#allocation41_spill]] }
  0x60   : > { %s3705_s23 = scalar_lea.hbm %s4976_s8, 2048 }
  0x61   : > { %p3706_p11 = scmp.ne.s32.totalorder %s4976_s8, %s3705_s23  ;;  %p3712_p0 = scmp.lt.u32.totalorder %s3705_s23, %s4976_s8 }
  0x63   : > { %p3708_p12 = pnand %p3706_p11, %p4299_p8 }
  0x65   : > { %p3709_p13 = pneg %p3708_p12 }
  0x67   : > { %p3714_p2 = pnand %p3712_p0, %p3709_p13 }
  0x69   : > { %3717 = shalt.err (!%p3714_p2)
}
  0x6a   : > { %s3718_s27 = scalar_lea.vmem %s4289_s29, 2048  ;;  %p3726_p4 = scmp.lt.s32.totalorder %s4289_s29, %s4289_s29 }
  0x6b   : > { %p3719_p5 = scmp.ne.s32.totalorder %s4289_s29, %s3718_s27  ;;  %p3727_p10 = scmp.lt.s32.totalorder %s3718_s27, %s3718_s27 }
  0x6d   : > { %p3721_p7 = pnand %p3719_p5, %p4299_p8  ;;  %p3728_p11 = por %p3727_p10, %p3726_p4 }
  0x6f   : > { %p3722_p9 = pneg %p3721_p7 }
  0x71   : > { %p3729_p12 = pnand %p3728_p11, %p3722_p9 }
  0x73   : > { %3732 = shalt.err (!%p3729_p12)
}
  0x74   : > { %3544 = dma.hbm_to_vmem [thread:$0]  (!%p4283_p6), %s4976_s8, 2048, %s4289_s29, [#allocation12], %s4110_s22, %s4110_s22, %s4111_s18  }
  0x75   : > { %s4112_s11 = smov [#allocation14]   ;;  %s4113_s2 = smov [#allocation17]  }
  0x76   : > { %s672_s12 = sshll.u32 %s4112_s11, 4  ;;  %s701_s23 = sshll.u32 %s4113_s2, 4  ;;  %s673_s12 = int_to_ptr.vmem [resolvable:$true] %s672_s12  ;;  %s702_s23 = int_to_ptr.vmem [resolvable:$true] %s701_s23 }
  0x77   : > { %s4977_s13 = sld [smem:[#allocation45_spill]] }
  0x7d   : > { %s3733_s28 = scalar_lea.hbm %s4977_s13, 2048 }
  0x7e   : > { %p3734_p13 = scmp.ne.s32.totalorder %s4977_s13, %s3733_s28  ;;  %p3740_p5 = scmp.lt.u32.totalorder %s3733_s28, %s4977_s13 }
  0x80   : > { %p3736_p0 = pnand %p3734_p13, %p4299_p8 }
  0x82   : > { %p3737_p2 = pneg %p3736_p0 }
  0x84   : > { %p3742_p7 = pnand %p3740_p5, %p3737_p2 }
  0x86   : > { %3745 = shalt.err (!%p3742_p7)
}
  0x87   : > { %s3746_s29 = scalar_lea.vmem %s673_s12, 2048  ;;  %p3754_p11 = scmp.lt.s32.totalorder %s673_s12, %s673_s12 }
  0x88   : > { %p3747_p9 = scmp.ne.s32.totalorder %s673_s12, %s3746_s29  ;;  %p3755_p12 = scmp.lt.s32.totalorder %s3746_s29, %s3746_s29 }
  0x8a   : > { %p3749_p4 = pnand %p3747_p9, %p4299_p8  ;;  %p3756_p1 = por %p3755_p12, %p3754_p11 }
  0x8c   : > { %p3750_p10 = pneg %p3749_p4 }
  0x8e   : > { %p3757_p3 = pnand %p3756_p1, %p3750_p10 }
  0x90   : > { %3760 = shalt.err (!%p3757_p3)
}
  0x91   : > { %3550 = dma.hbm_to_vmem [thread:$0]  (!%p4283_p6), %s4977_s13, 2048, %s673_s12, [#allocation15], %s4110_s22, %s4110_s22, %s4111_s18  }
  0x92   : > { %s3761_s3 = scalar_lea.hbm %s4932_s16, 2048 }
  0x93   : > { %p3762_p1 = scmp.ne.s32.totalorder %s4932_s16, %s3761_s3  ;;  %p3768_p0 = scmp.lt.u32.totalorder %s3761_s3, %s4932_s16 }
  0x95   : > { %p3764_p3 = pnand %p3762_p1, %p4299_p8 }
  0x97   : > { %p3765_p13 = pneg %p3764_p3 }
  0x99   : > { %p3770_p2 = pnand %p3768_p0, %p3765_p13 }
  0x9b   : > { %3773 = shalt.err (!%p3770_p2)
}
  0x9c   : > { %s3774_s1 = scalar_lea.vmem %s702_s23, 2048  ;;  %p3782_p4 = scmp.lt.s32.totalorder %s702_s23, %s702_s23 }
  0x9d   : > { %p3775_p5 = scmp.ne.s32.totalorder %s702_s23, %s3774_s1  ;;  %p3783_p10 = scmp.lt.s32.totalorder %s3774_s1, %s3774_s1 }
  0x9f   : > { %p3777_p7 = pnand %p3775_p5, %p4299_p8  ;;  %p3784_p11 = por %p3783_p10, %p3782_p4 }
  0xa1   : > { %p3778_p9 = pneg %p3777_p7 }
  0xa3   : > { %p3785_p12 = pnand %p3784_p11, %p3778_p9 }
  0xa5   : > { %3788 = shalt.err (!%p3785_p12)
}
  0xa6   : > { %3556 = dma.hbm_to_vmem [thread:$0]  (!%p4283_p6), %s4932_s16, 2048, %s702_s23, [#allocation18], %s4110_s22, %s4110_s22, %s4111_s18  }
  0xa7   : > { %s4114_s5 = smov [#allocation20]   ;;  %s4115_s11 = smov [#allocation7]  }
  0xa8   : > { %s730_s9 = sshll.u32 %s4114_s5, 4  ;;  %s595_s2 = sshll.u32 %s4115_s11, 4  ;;  %s731_s9 = int_to_ptr.vmem [resolvable:$true] %s730_s9  ;;  %s596_s2 = int_to_ptr.vmem [resolvable:$true] %s595_s2 }
  0xa9   : > { %s3789_s28 = scalar_lea.hbm %s4935_s19, 2048 }
  0xaa   : > { %p3790_p1 = scmp.ne.s32.totalorder %s4935_s19, %s3789_s28  ;;  %p3796_p0 = scmp.lt.u32.totalorder %s3789_s28, %s4935_s19 }
  0xac   : > { %p3792_p3 = pnand %p3790_p1, %p4299_p8 }
  0xae   : > { %p3793_p13 = pneg %p3792_p3 }
  0xb0   : > { %p3798_p2 = pnand %p3796_p0, %p3793_p13 }
  0xb2   : > { %3801 = shalt.err (!%p3798_p2)
}
  0xb3   : > { %s3802_s23 = scalar_lea.vmem %s731_s9, 2048  ;;  %p3810_p4 = scmp.lt.s32.totalorder %s731_s9, %s731_s9 }
  0xb4   : > { %p3803_p5 = scmp.ne.s32.totalorder %s731_s9, %s3802_s23  ;;  %p3811_p10 = scmp.lt.s32.totalorder %s3802_s23, %s3802_s23 }
  0xb6   : > { %p3805_p7 = pnand %p3803_p5, %p4299_p8  ;;  %p3812_p11 = por %p3811_p10, %p3810_p4 }
  0xb8   : > { %p3806_p9 = pneg %p3805_p7 }
  0xba   : > { %p3813_p12 = pnand %p3812_p11, %p3806_p9 }
  0xbc   : > { %3816 = shalt.err (!%p3813_p12)
}
  0xbd   : > { %3562 = dma.hbm_to_vmem [thread:$0]  (!%p4283_p6), %s4935_s19, 2048, %s731_s9, [#allocation21], %s4110_s22, %s4110_s22, %s4111_s18  }
  0xbe   : > { %s4978_s0 = sld [smem:[#allocation37_spill]] }
  0xc4   : > { %s3817_s28 = scalar_lea.hbm %s4978_s0, 2048 }
  0xc5   : > { %p3818_p1 = scmp.ne.s32.totalorder %s4978_s0, %s3817_s28  ;;  %p3824_p0 = scmp.lt.u32.totalorder %s3817_s28, %s4978_s0 }
  0xc7   : > { %p3820_p3 = pnand %p3818_p1, %p4299_p8 }
  0xc9   : > { %p3821_p13 = pneg %p3820_p3 }
  0xcb   : > { %p3826_p2 = pnand %p3824_p0, %p3821_p13 }
  0xcd   : > { %3829 = shalt.err (!%p3826_p2)
}
  0xce   : > { %s3830_s23 = scalar_lea.vmem %s596_s2, 2048  ;;  %p3838_p4 = scmp.lt.s32.totalorder %s596_s2, %s596_s2 }
  0xcf   : > { %p3831_p5 = scmp.ne.s32.totalorder %s596_s2, %s3830_s23  ;;  %p3839_p10 = scmp.lt.s32.totalorder %s3830_s23, %s3830_s23 }
  0xd1   : > { %p3833_p7 = pnand %p3831_p5, %p4299_p8  ;;  %p3840_p11 = por %p3839_p10, %p3838_p4 }
  0xd3   : > { %p3834_p9 = pneg %p3833_p7 }
  0xd5   : > { %p3841_p12 = pnand %p3840_p11, %p3834_p9 }
  0xd7   : > { %3844 = shalt.err (!%p3841_p12)
}
  0xd8   : > { %3535 = dma.hbm_to_vmem [thread:$0]  (!%p4283_p6), %s4978_s0, 2048, %s596_s2, [#allocation6], %s4110_s22, %s4110_s22, %s4111_s18  }
  0xd9   : > { %s4116_s5 = smov [#allocation10]   ;;  %s4117_s3 = smov [#allocation13]  }
  0xda   : > { %s624_s11 = sshll.u32 %s4116_s5, 4  ;;  %s653_s28 = sshll.u32 %s4117_s3, 4  ;;  %s625_s11 = int_to_ptr.vmem [resolvable:$true] %s624_s11  ;;  %s654_s28 = int_to_ptr.vmem [resolvable:$true] %s653_s28 }
  0xdb   : > { %s4979_s1 = sld [smem:[#allocation40_spill]] }
  0xe1   : > { %s3845_s12 = scalar_lea.hbm %s4979_s1, 2048 }
  0xe2   : > { %p3846_p1 = scmp.ne.s32.totalorder %s4979_s1, %s3845_s12  ;;  %p3852_p0 = scmp.lt.u32.totalorder %s3845_s12, %s4979_s1 }
  0xe4   : > { %p3848_p3 = pnand %p3846_p1, %p4299_p8 }
  0xe6   : > { %p3849_p13 = pneg %p3848_p3 }
  0xe8   : > { %p3854_p2 = pnand %p3852_p0, %p3849_p13 }
  0xea   : > { %3857 = shalt.err (!%p3854_p2)
}
  0xeb   : > { %s3858_s2 = scalar_lea.vmem %s625_s11, 2048  ;;  %p3866_p4 = scmp.lt.s32.totalorder %s625_s11, %s625_s11 }
  0xec   : > { %p3859_p5 = scmp.ne.s32.totalorder %s625_s11, %s3858_s2  ;;  %p3867_p10 = scmp.lt.s32.totalorder %s3858_s2, %s3858_s2 }
  0xee   : > { %p3861_p7 = pnand %p3859_p5, %p4299_p8  ;;  %p3868_p11 = por %p3867_p10, %p3866_p4 }
  0xf0   : > { %p3862_p9 = pneg %p3861_p7 }
  0xf2   : > { %p3869_p12 = pnand %p3868_p11, %p3862_p9 }
  0xf4   : > { %3872 = shalt.err (!%p3869_p12)
}
  0xf5   : > { %3541 = dma.hbm_to_vmem [thread:$0]  (!%p4283_p6), %s4979_s1, 2048, %s625_s11, [#allocation9], %s4110_s22, %s4110_s22, %s4111_s18  }
  0xf6   : > { %s3873_s3 = scalar_lea.hbm %s4926_s10, 2048 }
  0xf7   : > { %p3874_p1 = scmp.ne.s32.totalorder %s4926_s10, %s3873_s3  ;;  %p3880_p0 = scmp.lt.u32.totalorder %s3873_s3, %s4926_s10 }
  0xf9   : > { %p3876_p3 = pnand %p3874_p1, %p4299_p8 }
  0xfb   : > { %p3877_p13 = pneg %p3876_p3 }
  0xfd   : > { %p3882_p2 = pnand %p3880_p0, %p3877_p13 }
  0xff   : > { %3885 = shalt.err (!%p3882_p2)
}
 0x100   : > { %s3886_s9 = scalar_lea.vmem %s654_s28, 2048  ;;  %p3894_p4 = scmp.lt.s32.totalorder %s654_s28, %s654_s28 }
 0x101   : > { %p3887_p5 = scmp.ne.s32.totalorder %s654_s28, %s3886_s9  ;;  %p3895_p10 = scmp.lt.s32.totalorder %s3886_s9, %s3886_s9 }
 0x103   : > { %p3889_p7 = pnand %p3887_p5, %p4299_p8  ;;  %p3896_p11 = por %p3895_p10, %p3894_p4 }
 0x105   : > { %p3890_p9 = pneg %p3889_p7 }
 0x107   : > { %p3897_p12 = pnand %p3896_p11, %p3890_p9 }
 0x109   : > { %3900 = shalt.err (!%p3897_p12)
}
 0x10a   : > { %3547 = dma.hbm_to_vmem [thread:$0]  (!%p4283_p6), %s4926_s10, 2048, %s654_s28, [#allocation12], %s4110_s22, %s4110_s22, %s4111_s18  }
 0x10b   : > { %s4118_s8 = smov [#allocation16]   ;;  %s4119_s29 = smov [#allocation19]  }
 0x10c   : > { %s685_s13 = sshll.u32 %s4118_s8, 4  ;;  %s714_s5 = sshll.u32 %s4119_s29, 4  ;;  %s686_s13 = int_to_ptr.vmem [resolvable:$true] %s685_s13  ;;  %s715_s5 = int_to_ptr.vmem [resolvable:$true] %s714_s5 }
 0x10d   : > { %s3901_s27 = scalar_lea.hbm %s4930_s14, 2048 }
 0x10e   : > { %p3902_p1 = scmp.ne.s32.totalorder %s4930_s14, %s3901_s27  ;;  %p3908_p0 = scmp.lt.u32.totalorder %s3901_s27, %s4930_s14 }
 0x110   : > { %p3904_p3 = pnand %p3902_p1, %p4299_p8 }
 0x112   : > { %p3905_p13 = pneg %p3904_p3 }
 0x114   : > { %p3910_p2 = pnand %p3908_p0, %p3905_p13 }
 0x116   : > { %3913 = shalt.err (!%p3910_p2)
}
 0x117   : > { %s3914_s28 = scalar_lea.vmem %s686_s13, 2048  ;;  %p3922_p4 = scmp.lt.s32.totalorder %s686_s13, %s686_s13 }
 0x118   : > { %p3915_p5 = scmp.ne.s32.totalorder %s686_s13, %s3914_s28  ;;  %p3923_p10 = scmp.lt.s32.totalorder %s3914_s28, %s3914_s28 }
 0x11a   : > { %p3917_p7 = pnand %p3915_p5, %p4299_p8  ;;  %p3924_p11 = por %p3923_p10, %p3922_p4 }
 0x11c   : > { %p3918_p9 = pneg %p3917_p7 }
 0x11e   : > { %p3925_p12 = pnand %p3924_p11, %p3918_p9 }
 0x120   : > { %3928 = shalt.err (!%p3925_p12)
}
 0x121   : > { %3553 = dma.hbm_to_vmem [thread:$0]  (!%p4283_p6), %s4930_s14, 2048, %s686_s13, [#allocation15], %s4110_s22, %s4110_s22, %s4111_s18  }
 0x122   : > { %s3929_s20 = scalar_lea.hbm %s4933_s17, 2048 }
 0x123   : > { %p3930_p1 = scmp.ne.s32.totalorder %s4933_s17, %s3929_s20  ;;  %p3936_p0 = scmp.lt.u32.totalorder %s3929_s20, %s4933_s17 }
 0x125   : > { %p3932_p3 = pnand %p3930_p1, %p4299_p8 }
 0x127   : > { %p3933_p13 = pneg %p3932_p3 }
 0x129   : > { %p3938_p2 = pnand %p3936_p0, %p3933_p13 }
 0x12b   : > { %3941 = shalt.err (!%p3938_p2)
}
 0x12c   : > { %s3942_s11 = scalar_lea.vmem %s715_s5, 2048  ;;  %p3950_p4 = scmp.lt.s32.totalorder %s715_s5, %s715_s5 }
 0x12d   : > { %p3943_p5 = scmp.ne.s32.totalorder %s715_s5, %s3942_s11  ;;  %p3951_p10 = scmp.lt.s32.totalorder %s3942_s11, %s3942_s11 }
 0x12f   : > { %p3945_p7 = pnand %p3943_p5, %p4299_p8  ;;  %p3952_p11 = por %p3951_p10, %p3950_p4 }
 0x131   : > { %p3946_p9 = pneg %p3945_p7 }
 0x133   : > { %p3953_p12 = pnand %p3952_p11, %p3946_p9 }
 0x135   : > { %3956 = shalt.err (!%p3953_p12)
}
 0x136   : > { %3559 = dma.hbm_to_vmem [thread:$0]  (!%p4283_p6), %s4933_s17, 2048, %s715_s5, [#allocation18], %s4110_s22, %s4110_s22, %s4111_s18  }
 0x137   : > { %s4120_s2 = smov [#allocation22]   ;;  %s3957_s20 = scalar_lea.hbm %s4937_s21, 2048 }
 0x138   : > { %s746_s8 = sshll.u32 %s4120_s2, 4  ;;  %p3958_p1 = scmp.ne.s32.totalorder %s4937_s21, %s3957_s20  ;;  %s747_s8 = int_to_ptr.vmem [resolvable:$true] %s746_s8 }
 0x139   : > { %p3964_p0 = scmp.lt.u32.totalorder %s3957_s20, %s4937_s21 }
 0x13a   : > { %p3960_p3 = pnand %p3958_p1, %p4299_p8 }
 0x13c   : > { %p3961_p13 = pneg %p3960_p3 }
 0x13e   : > { %p3966_p2 = pnand %p3964_p0, %p3961_p13 }
 0x140   : > { %3969 = shalt.err (!%p3966_p2)
}
 0x141   : > { %s3970_s5 = scalar_lea.vmem %s747_s8, 2048  ;;  %p3978_p4 = scmp.lt.s32.totalorder %s747_s8, %s747_s8 }
 0x142   : > { %p3971_p5 = scmp.ne.s32.totalorder %s747_s8, %s3970_s5  ;;  %p3979_p10 = scmp.lt.s32.totalorder %s3970_s5, %s3970_s5 }
 0x144   : > { %p3973_p7 = pnand %p3971_p5, %p4299_p8  ;;  %p3980_p11 = por %p3979_p10, %p3978_p4 }
 0x146   : > { %p3974_p9 = pneg %p3973_p7 }
 0x148   : > { %p3981_p12 = pnand %p3980_p11, %p3974_p9 }
 0x14a   : > { %3984 = shalt.err (!%p3981_p12)
}
 0x14b   : > { %3565 = dma.hbm_to_vmem [thread:$0]  (!%p4283_p6), %s4937_s21, 2048, %s747_s8, [#allocation21], %s4110_s22, %s4110_s22, %s4111_s18  }
 0x14c   : > { %s2489_s7 = sadd.s32 4294967294, %s4105_s25   ;;  %s4566_s6 = sadd.s32 1, %s4105_s25  }
 0x14d   : > { %s49_s28 = ssub.s32 %s4105_s25, %s4566_s6  ;;  %s52_s2 = sadd.s32 1, %s4101_s24 }
 0x14e   : > { %p50_p8 = scmp.eq.s32.totalorder %s49_s28, 0  ;;  %p59_p1 = scmp.ne.s32.totalorder %s4101_s24, %s4097_s30 }
 0x14f   : > { %p60_p3 = scmp.eq.s32.totalorder %s4105_s25, 0  ;;  %p65_p13 = scmp.ne.s32.totalorder %s4097_s30, %s4093_s4 }
 0x150   : > { %s4577_s29 = scalar_select %p50_p8, %s4101_s24, %s52_s2  }
 0x151   : > { %p4579_p0 = por %p60_p3, %p59_p1  ;;  %p4981_p2 = scmp.eq.s32.totalorder %s4267_s26, 0 }
 0x152   : > { %p551_p5 = scmp.eq.s32.totalorder %s4267_s26, 1  ;;  %p557_p7 = scmp.eq.s32.totalorder %s2489_s7, 1 }
 0x153   : > { %p4585_p6 = por %p4981_p2, %p65_p13  ;;  %p3586_p9 = scmp.lt.s32.totalorder %s4105_s25, 2 }
 0x154   : > { %s763_s18 = sand.u32 1, %s4101_s24   ;;  %p4592_p4 = por %p551_p5, %p59_p1 }
 0x155   : > { %p4596_p10 = por %p557_p7, %p65_p13  ;;  %s2504_s27 = sshll.u32 %s763_s18, 3 }
 0x156   : > { %s4983_s8 = scalar_select %p4592_p4, 1, 0 }
 0x157   : > { %s4984_s20 = scalar_select %p4596_p10, 1, 0 }
 0x158   : > { %s2505_s12 = sshll.u32 %s4105_s25, 7  ;;  %s4985_s5 = sld [smem:[#allocation33_spill]] }
 0x159   : > { %s767_s13 = scalar_lea.vmem [#allocation2], %s2504_s27  ;;  %p4610_p11 = pnand %p3586_p9, %p4579_p0 }
 0x15a   : > { %s774_s7 = sshll.u32 %s767_s13, 4  ;;  %s764_s2 = scalar_lea.sflag [#allocation3], %s763_s18  ;;  %s4606_s7 = int_to_ptr.vmem [resolvable:$true] %s774_s7 }
 0x15b   : > { %p3987_p8 = pneg %p4610_p11 }
 0x15e   : > { %s4604_s11 = scalar_lea.hbm %s4985_s5, %s2505_s12  ;;  %s3990_s23 = scalar_lea.hbm %s4985_s5, 256 }
 0x15f   : > { %s3985_s0 = scalar_lea.hbm %s4604_s11, 128  ;;  %p3991_p13 = scmp.lt.u32.totalorder %s4604_s11, %s4985_s5 }
 0x160   : > { %p3986_p12 = scmp.ne.s32.totalorder %s4604_s11, %s3985_s0  ;;  %p3992_p0 = scmp.lt.u32.totalorder %s3990_s23, %s3985_s0 }
 0x161   : > { %p3994_p5 = scmp.lt.u32.totalorder %s3985_s0, %s4604_s11 }
 0x162   : > { %p3988_p1 = pnand %p3987_p8, %p3986_p12  ;;  %p3993_p2 = por %p3992_p0, %p3991_p13 }
 0x164   : > { %p3989_p3 = pneg %p3988_p1  ;;  %p3995_p7 = por %p3994_p5, %p3993_p2 }
 0x166   : > { %p3996_p9 = pnand %p3995_p7, %p3989_p3 }
 0x168   : > { %3999 = shalt.err (!%p3996_p9)
}
 0x169   : > { %s4000_s18 = scalar_lea.vmem %s4606_s7, 128  ;;  %s4121_s13 = smov [#allocation2]  }
 0x16a   : > { %p4001_p12 = scmp.ne.s32.totalorder %s4606_s7, %s4000_s18  ;;  %s4005_s27 = sshll.u32 %s4121_s13, 4  ;;  %s4006_s27 = int_to_ptr.vmem [resolvable:$false] %s4005_s27 }
 0x16b   : > { %s4007_s12 = scalar_lea.vmem %s4006_s27, 256  ;;  %p4008_p4 = scmp.lt.s32.totalorder %s4606_s7, %s4006_s27 }
 0x16c   : > { %p4003_p1 = pnand %p4001_p12, %p3987_p8  ;;  %p4009_p13 = scmp.lt.s32.totalorder %s4007_s12, %s4000_s18 }
 0x16e   : > { %p4004_p10 = pneg %p4003_p1  ;;  %p4010_p0 = por %p4009_p13, %p4008_p4 }
 0x170   : > { %p4011_p2 = pnand %p4010_p0, %p4004_p10 }
 0x172   : > { %4014 = shalt.err (!%p4011_p2)
}
 0x173   : > { %3569 = dma.hbm_to_vmem [thread:$0]  (!%p4610_p11), %s4604_s11, 128, %s4606_s7, %s764_s2  }
 0x174   : > { %s4987_s0 = sld [smem:[#allocation32_spill]] }
 0x17a   : > { %p4988_p3 = scmp.ne.s32.totalorder %s4987_s0, 0 }
 0x17b   : > { %s4642_s23 = sand.u32 (!%p4988_p3), 1, %s4097_s30  }
 0x17c   : > { %783 = sbr.rel (%p4988_p3) target bundleno = 2672 (0xa70), region = 112  ;;  %s2507_s3 = sshll.u32 (!%p4988_p3), %s4642_s23, 3 }
 0x17d   : > { %s786_s9 = scalar_lea.sflag (!%p4988_p3), [#allocation3], %s4642_s23  ;;  %s4648_s18 = scalar_lea.vmem (!%p4988_p3), [#allocation2], %s2507_s3 }
 0x183   : > { %4060 = dma.done.wait (%p4585_p6), %s786_s9, 128  }
 0x184   : > { %4062 = vsyncadd (%p4585_p6), %s786_s9, 4294967168  ;;  %p4989_p4 = scmp.eq.s32.totalorder %s4267_s26, 0 }
 0x186   : > { %4064 = dma.done.wait (%p4989_p4), [#allocation6], 4096   ;;  %p4990_p10 = pmov %p4989_p4 }
 0x187   : > { %p4991_p11 = pmov %p4989_p4 }
 0x188   : > { %4066 = vsyncadd (%p4990_p10), [#allocation6], 4294963200 }
 0x189   : > { %4068 = dma.done.wait (%p4991_p11), [#allocation9], 4096   ;;  %p4992_p8 = pmov %p4989_p4 }
 0x18a   : > { %p4993_p5 = pmov %p4989_p4 }
 0x18b   : > { %4070 = vsyncadd (%p4992_p8), [#allocation9], 4294963200 }
 0x18c   : > { %4072 = dma.done.wait (%p4993_p5), [#allocation12], 4096   ;;  %p4994_p7 = pmov %p4989_p4 }
 0x18d   : > { %p4995_p6 = pmov %p4989_p4 }
 0x18e   : > { %4074 = vsyncadd (%p4994_p7), [#allocation12], 4294963200 }
 0x18f   : > { %4076 = dma.done.wait (%p4995_p6), [#allocation15], 4096   ;;  %p4996_p9 = pmov %p4989_p4 }
 0x190   : > { %p4997_p12 = pmov %p4989_p4 }
 0x191   : > { %4078 = vsyncadd (%p4996_p9), [#allocation15], 4294963200 }
 0x192   : > { %4080 = dma.done.wait (%p4997_p12), [#allocation18], 4096   ;;  %p4998_p1 = pmov %p4989_p4 }
 0x194   : > { %4082 = vsyncadd (%p4998_p1), [#allocation18], 4294963200  ;;  %p4999_p13 = pmov %p4998_p1 }
 0x195   : > { %p5000_p0 = pmov %p4998_p1 }
 0x196   : > { %4084 = dma.done.wait (%p4999_p13), [#allocation21], 4096  }
 0x197   : > { %4086 = vsyncadd (%p5000_p0), [#allocation21], 4294963200  ;;  %v4122_v0 = vmov 0.0|0.0   ;;  %vm4123_vm0 = vmmov 0   ;;  %v4124_v1 = vmov 0.0   ;;  %v900_v2 = vld [vmem:[#allocation5] sm:$0xff] }
 0x198   : > { %3189 = vmatprep.subr.bf16.mxu0 %v4122_v0  ;;  %2781 = vmatprep.mubr.msk.f32.mxu0 %vm4123_vm0, %v4124_v1  ;;  %v901_v3 = vld [vmem:[#allocation5 + $0x8] sm:$0xff]  ;;  %v902_v4 = vld [vmem:[#allocation5 + $0x10] sm:$0xff]  ;;  %v903_v6 = vld [vmem:[#allocation5 + $0x18] sm:$0xff]  ;;  %s5001_s7 = sld [smem:[#allocation35_spill]]  ;;  %s5002_s13 = sld [smem:[#allocation36_spill]]  ;;  %vm1078_vm1 = vcmask 64512  }
 0x199   : > { %2784 = vmatprep.subr.mxu1 %v4124_v1  ;;  %2786 = vmatprep.mubr.msk.f32.mxu1 %vm4123_vm0, %v4124_v1  ;;  %v3190_v5 = vpack.c.bf16 %v901_v3, %v900_v2  ;;  %v3193_v7 = vpack.c.bf16 %v903_v6, %v902_v4  ;;  %v904_v8 = vld [vmem:[#allocation5 + $0x20] sm:$0xff]  ;;  %v905_v9 = vld [vmem:[#allocation5 + $0x28] sm:$0xff]  ;;  %v906_v11 = vld [vmem:[#allocation5 + $0x30] sm:$0xff]  ;;  %s5003_s0 = sld [smem:[#allocation39_spill]]  ;;  %s5004_s22 = sld [smem:[#allocation42_spill]] }
 0x19a   : > { %v3196_v10 = vpack.c.bf16 %v905_v9, %v904_v8  ;;  %v907_v12 = vld [vmem:[#allocation5 + $0x38] sm:$0xff]  ;;  %v908_v14 = vld [vmem:[#allocation5 + $0x40] sm:$0xff]  ;;  %v909_v15 = vld [vmem:[#allocation5 + $0x48] sm:$0xff]  ;;  %s5005_s28 = sld [smem:[#allocation43_spill]]  ;;  %s5006_s27 = sld [smem:[#allocation44_spill]] }
 0x19b   : > { %3191 = vmatpush3.bf16.msra.mxu0 %v3190_v5  ;;  %v3199_v13 = vpack.c.bf16 %v907_v12, %v906_v11  ;;  %v3202_v16 = vpack.c.bf16 %v909_v15, %v908_v14  ;;  %v910_v17 = vld [vmem:[#allocation5 + $0x50] sm:$0xff]  ;;  %v911_v18 = vld [vmem:[#allocation5 + $0x58] sm:$0xff]  ;;  %v912_v20 = vld [vmem:[#allocation5 + $0x60] sm:$0xff]  ;;  %s5007_s9 = sld [smem:[#allocation46_spill]]  ;;  %s5008_s11 = sld [smem:[#allocation47_spill]] }
 0x19c   : > { %3192 = vmatprep.subr.bf16.mxu0 %v4122_v0  ;;  %v3205_v19 = vpack.c.bf16 %v911_v18, %v910_v17  ;;  %v913_v21 = vld [vmem:[#allocation5 + $0x68] sm:$0xff]  ;;  %v914_v23 = vld [vmem:[#allocation5 + $0x70] sm:$0xff]  ;;  %v915_v24 = vld [vmem:[#allocation5 + $0x78] sm:$0xff]  ;;  %s5009_s2 = sld [smem:[#allocation48_spill]]  ;;  %s5010_s12 = sld [smem:[#allocation49_spill]] }
 0x19d   : > { %v3208_v22 = vpack.c.bf16 %v913_v21, %v912_v20  ;;  %v3211_v25 = vpack.c.bf16 %v915_v24, %v914_v23  ;;  %v1011_v26 = vld [vmem:[#allocation8] sm:$0xff]  ;;  %v1012_v27 = vld [vmem:[#allocation8 + $0x8] sm:$0xff]  ;;  %v917_v28 = vld [vmem:[%s4648_s18] sm:$0xff]  ;;  %p5012_p3 = scmp.ne.s32.totalorder %s4983_s8, 0 }
 0x19e   : > { %v3238_v29 = vpack.c.bf16 %v1012_v27, %v1011_v26  ;;  %v1013_v30 = vld [vmem:[#allocation8 + $0x10] sm:$0xff]  ;;  %v1014_v31 = vld [vmem:[#allocation8 + $0x18] sm:$0xff]  ;;  %v1015_v33 = vld [vmem:[#allocation8 + $0x20] sm:$0xff] }
 0x19f   : > { %3194 = vmatpush3.bf16.msra.mxu0 %v3193_v7  ;;  %v3241_v32 = vpack.c.bf16 %v1014_v31, %v1013_v30  ;;  %v1016_v34 = vld [vmem:[#allocation8 + $0x28] sm:$0xff]  ;;  %v1017_v36 = vld [vmem:[#allocation8 + $0x30] sm:$0xff]  ;;  %v1018_v37 = vld [vmem:[#allocation8 + $0x38] sm:$0xff] }
 0x1a0   : > { %3195 = vmatprep.subr.bf16.mxu0 %v4122_v0  ;;  %v3244_v35 = vpack.c.bf16 %v1016_v34, %v1015_v33  ;;  %v3247_v38 = vpack.c.bf16 %v1018_v37, %v1017_v36  ;;  %v1019_v39 = vld [vmem:[#allocation8 + $0x40] sm:$0xff]  ;;  %v1020_v40 = vld [vmem:[#allocation8 + $0x48] sm:$0xff]  ;;  %v1021_v42 = vld [vmem:[#allocation8 + $0x50] sm:$0xff] }
 0x1a1   : > { %v3250_v41 = vpack.c.bf16 %v1020_v40, %v1019_v39  ;;  %v1022_v43 = vld [vmem:[#allocation8 + $0x58] sm:$0xff]  ;;  %v1023_v45 = vld [vmem:[#allocation8 + $0x60] sm:$0xff]  ;;  %v1024_v46 = vld [vmem:[#allocation8 + $0x68] sm:$0xff] }
 0x1a2   : > { %v3253_v44 = vpack.c.bf16 %v1022_v43, %v1021_v42  ;;  %v3256_v47 = vpack.c.bf16 %v1024_v46, %v1023_v45  ;;  %v1025_v48 = vld [vmem:[#allocation8 + $0x70] sm:$0xff]  ;;  %v1026_v49 = vld [vmem:[#allocation8 + $0x78] sm:$0xff]  ;;  %v995_v52 = vld [vmem:[#allocation7] sm:$0xff] }
 0x1a3   : > { %3197 = vmatpush3.bf16.msra.mxu0 %v3196_v10  ;;  %v3259_v50 = vpack.c.bf16 %v1026_v49, %v1025_v48  ;;  %v2521_v51 = vld [vmem:[%s5001_s7] ss:$0 sm:$0xff]  ;;  %v996_v53 = vld [vmem:[#allocation7 + $0x8] sm:$0xff]  ;;  %v998_v60 = vld [vmem:[#allocation7 + $0x18] sm:$0xff]  ;;  %s5011_s7 = sld [smem:[#allocation50_spill]] }
 0x1a4   : > { %3198 = vmatprep.subr.bf16.mxu0 %v4122_v0  ;;  %v4711_v57 = vld [vmem:[%s5002_s13] sm:$0xff]  ;;  %v3214_v58 = vpack.c.bf16 %v996_v53, %v995_v52  ;;  %v999_v62 = vld [vmem:[#allocation7 + $0x20] sm:$0xff]  ;;  %v1000_v63 = vld [vmem:[#allocation7 + $0x28] sm:$0xff] }
 0x1a5   : > { %v997_v59 = vld [vmem:[#allocation7 + $0x10] sm:$0xff]  ;;  %v3220_v2 = vpack.c.bf16 %v1000_v63, %v999_v62  ;;  %v1002_v4 = vld [vmem:[#allocation7 + $0x38] sm:$0xff]  ;;  %v1003_v6 = vld [vmem:[#allocation7 + $0x40] sm:$0xff] }
 0x1a6   : > { %v3217_v61 = vpack.c.bf16 %v998_v60, %v997_v59  ;;  %v1001_v3 = vld [vmem:[#allocation7 + $0x30] sm:$0xff]  ;;  %v1004_v7 = vld [vmem:[#allocation7 + $0x48] sm:$0xff]  ;;  %v1006_v10 = vld [vmem:[#allocation7 + $0x58] sm:$0xff] }
 0x1a7   : > { %3200 = vmatpush3.bf16.msra.mxu0 %v3199_v13  ;;  %v3223_v5 = vpack.c.bf16 %v1002_v4, %v1001_v3  ;;  %v3226_v8 = vpack.c.bf16 %v1004_v7, %v1003_v6  ;;  %v1005_v9 = vld [vmem:[#allocation7 + $0x50] sm:$0xff]  ;;  %v1007_v12 = vld [vmem:[#allocation7 + $0x60] sm:$0xff]  ;;  %v1008_v13 = vld [vmem:[#allocation7 + $0x68] sm:$0xff] }
 0x1a8   : > { %3201 = vmatprep.subr.bf16.mxu0 %v4122_v0  ;;  %v3229_v11 = vpack.c.bf16 %v1006_v10, %v1005_v9  ;;  %v3232_v14 = vpack.c.bf16 %v1008_v13, %v1007_v12  ;;  %v1009_v15 = vld [vmem:[#allocation7 + $0x70] sm:$0xff]  ;;  %v1044_v18 = vld [vmem:[#allocation11] sm:$0xff]  ;;  %v1053_v31 = vld [vmem:[#allocation11 + $0x48] sm:$0xff] }
 0x1a9   : > { %v1046_v20 = vld [vmem:[#allocation11 + $0x10] sm:$0xff]  ;;  %v1048_v24 = vld [vmem:[#allocation11 + $0x20] sm:$0xff]  ;;  %v1055_v34 = vld [vmem:[#allocation11 + $0x58] sm:$0xff] }
 0x1aa   : > { %v1050_v27 = vld [vmem:[#allocation11 + $0x30] sm:$0xff]  ;;  %v1052_v30 = vld [vmem:[#allocation11 + $0x40] sm:$0xff]  ;;  %v1037_v4 = vld [vmem:[#allocation10 + $0x48] sm:$0xff] }
 0x1ab   : > { %3203 = vmatpush3.bf16.msra.mxu0 %v3202_v16  ;;  %v1010_v16 = vld [vmem:[#allocation7 + $0x78] sm:$0xff]  ;;  %v1054_v33 = vld [vmem:[#allocation11 + $0x50] sm:$0xff]  ;;  %v1056_v40 = vld [vmem:[#allocation11 + $0x60] sm:$0xff] }
 0x1ac   : > { %3204 = vmatprep.subr.bf16.mxu0 %v4122_v0  ;;  %v3235_v17 = vpack.c.bf16 %v1010_v16, %v1009_v15  ;;  %v1058_v43 = vld [vmem:[#allocation11 + $0x70] sm:$0xff]  ;;  %v1032_v60 = vld [vmem:[#allocation10 + $0x20] sm:$0xff]  ;;  %v1039_v7 = vld [vmem:[#allocation10 + $0x58] sm:$0xff] }
 0x1ad   : > { %v2523_v46 = vld [vmem:[%s5003_s0] ss:$0 sm:$0xff]  ;;  %v1036_v3 = vld [vmem:[#allocation10 + $0x40] sm:$0xff]  ;;  %v1041_v10 = vld [vmem:[#allocation10 + $0x68] sm:$0xff]  ;;  %s2534_s0 = sshll.u32 %s4267_s26, 7  ;;  %s4125_s26 = smov [#allocation23]  }
 0x1ae   : > { %v1034_v63 = vld [vmem:[#allocation10 + $0x30] sm:$0xff]  ;;  %v1040_v9 = vld [vmem:[#allocation10 + $0x60] sm:$0xff]  ;;  %v1043_v13 = vld [vmem:[#allocation10 + $0x78] sm:$0xff] }
 0x1af   : > { %3206 = vmatpush3.bf16.msra.mxu0 %v3205_v19  ;;  %v1045_v19 = vld [vmem:[#allocation11 + $0x8] sm:$0xff]  ;;  %v1038_v6 = vld [vmem:[#allocation10 + $0x50] sm:$0xff]  ;;  %v1061_v15 = vld [vmem:[#allocation13] sm:$0xff] }
 0x1b0   : > { %3207 = vmatprep.subr.bf16.mxu0 %v4122_v0  ;;  %v3286_v21 = vpack.c.bf16 %v1045_v19, %v1044_v18  ;;  %v1042_v12 = vld [vmem:[#allocation10 + $0x70] sm:$0xff]  ;;  %v1062_v16 = vld [vmem:[#allocation13 + $0x8] sm:$0xff] }
 0x1b1   : > { %v1063_v19 = vld [vmem:[#allocation13 + $0x10] sm:$0xff] }
 0x1b3   : > { %3209 = vmatpush3.bf16.msra.mxu0 %v3208_v22  ;;  %v1047_v22 = vld [vmem:[#allocation11 + $0x18] sm:$0xff] }
 0x1b4   : > { %3210 = vmatprep.subr.bf16.mxu0 %v4122_v0  ;;  %v3289_v23 = vpack.c.bf16 %v1047_v22, %v1046_v20  ;;  %v1064_v20 = vld [vmem:[#allocation13 + $0x18] sm:$0xff] }
 0x1b7   : > { %3212 = vmatpush3.bf16.msra.mxu0 %v3211_v25  ;;  %v1049_v25 = vld [vmem:[#allocation11 + $0x28] sm:$0xff] }
 0x1b8   : > { %3237 = vmatprep.subr.bf16.mxu0 %v4122_v0  ;;  %v3292_v26 = vpack.c.bf16 %v1049_v25, %v1048_v24  ;;  %v3313_v24 = vpack.c.bf16 %v1064_v20, %v1063_v19  ;;  %v1065_v25 = vld [vmem:[#allocation13 + $0x20] sm:$0xff] }
 0x1ba   : > { %2782 = vmatmul.mubr.f32.vlgmr.msra.gmra.mrb[0].mxu0 %v917_v28  ;;  %v1051_v28 = vld [vmem:[#allocation11 + $0x38] sm:$0xff] }
 0x1bb   : > { %3239 = vmatpush3.bf16.msra.mxu0 %v3238_v29  ;;  %2856 = vmatprep.mubr.msk.f32.mxu0 %vm4123_vm0, %v4124_v1  ;;  %v3295_v29 = vpack.c.bf16 %v1051_v28, %v1050_v27  ;;  %v1067_v28 = vld [vmem:[#allocation13 + $0x30] sm:$0xff] }
 0x1bc   : > { %3240 = vmatprep.subr.bf16.mxu0 %v4122_v0 }
 0x1bf   : > { %3242 = vmatpush3.bf16.msra.mxu0 %v3241_v32  ;;  %v3298_v32 = vpack.c.bf16 %v1053_v31, %v1052_v30  ;;  %v1069_v31 = vld [vmem:[#allocation13 + $0x40] sm:$0xff] }
 0x1c0   : > { %3243 = vmatprep.subr.bf16.mxu0 %v4122_v0 }
 0x1c3   : > { %3245 = vmatpush3.bf16.msra.mxu0 %v3244_v35  ;;  %v3301_v35 = vpack.c.bf16 %v1055_v34, %v1054_v33  ;;  %v1071_v34 = vld [vmem:[#allocation13 + $0x50] sm:$0xff] }
 0x1c4   : > { %3246 = vmatprep.subr.bf16.mxu0 %v4122_v0 }
 0x1c7   : > { %3248 = vmatpush3.bf16.msra.mxu0 %v3247_v38 }
 0x1c8   : > { %3249 = vmatprep.subr.bf16.mxu0 %v4122_v0 }
 0x1cb   : > { %3251 = vmatpush3.bf16.msra.mxu0 %v3250_v41  ;;  %v1057_v41 = vld [vmem:[#allocation11 + $0x68] sm:$0xff] }
 0x1cc   : > { %3252 = vmatprep.subr.bf16.mxu0 %v4122_v0  ;;  %v3304_v42 = vpack.c.bf16 %v1057_v41, %v1056_v40  ;;  %v1075_v40 = vld [vmem:[#allocation13 + $0x70] sm:$0xff]  ;;  %v1076_v41 = vld [vmem:[#allocation13 + $0x78] sm:$0xff] }
 0x1cf   : > { %3254 = vmatpush3.bf16.msra.mxu0 %v3253_v44  ;;  %v1059_v44 = vld [vmem:[#allocation11 + $0x78] sm:$0xff] }
 0x1d0   : > { %3255 = vmatprep.subr.bf16.mxu0 %v4122_v0  ;;  %v3307_v45 = vpack.c.bf16 %v1059_v44, %v1058_v43  ;;  %v1613_v43 = vld [vmem:[#allocation16] sm:$0xff]  ;;  %v1614_v44 = vld [vmem:[#allocation16 + $0x8] sm:$0xff] }
 0x1d3   : > { %3257 = vmatpush3.bf16.msra.mxu0 %v3256_v47 }
 0x1d4   : > { %3258 = vmatprep.subr.bf16.mxu0 %v4122_v0 }
 0x1d7   : > { %3260 = vmatpush3.bf16.msra.mxu0 %v3259_v50  ;;  %v1028_v50 = vld [vmem:[#allocation10] sm:$0xff] }
 0x1d8   : > { %3285 = vmatprep.subr.bf16.mxu0 %v4122_v0 }
 0x28d   : > { %v990_v54 = vpop.f32.mrb[0].mxu0 }
 0x28e   : > { %v4706_v55 = vadd.f32 %v2521_v51, %v990_v54  ;;  %v2783_v56 = vpop.f32.mrb[1].mxu0  ;;  %v1029_v51 = vld [vmem:[#allocation10 + $0x8] sm:$0xff] }
 0x28f   : > { %v3262_v54 = vpack.c.bf16 %v1029_v51, %v1028_v50  ;;  %v1030_v56 = vld [vmem:[#allocation10 + $0x10] sm:$0xff]  ;;  %v1618_v50 = vld [vmem:[#allocation16 + $0x28] sm:$0xff] }
 0x290   : > { %2785 = vmatpush3.msra.mxu1 %v4706_v55  ;;  %2857 = vmatmul.mubr.f32.vlgmr.msra.gmra.mrb[2].mxu0 %v4706_v55 }
 0x291   : > { %2787 = vmatmul.mubr.msk.f32.vlgmr.msra.gmra.mrb[0].mxu1 %vm1078_vm1, %v4711_v57  ;;  %3213 = vmatprep.subr.bf16.mxu1 %v4122_v0 }
 0x292   : > { %3215 = vmatpush3.bf16.msra.mxu1 %v3214_v58  ;;  %2821 = vmatprep.mubr.msk.f32.mxu1 %vm4123_vm0, %v4124_v1  ;;  %v1031_v58 = vld [vmem:[#allocation10 + $0x18] sm:$0xff] }
 0x293   : > { %3216 = vmatprep.subr.bf16.mxu1 %v4122_v0  ;;  %2931 = vmatprep.mubr.msk.f32.mxu0 %vm4123_vm0, %v4124_v1  ;;  %v3265_v59 = vpack.c.bf16 %v1031_v58, %v1030_v56  ;;  %v1622_v56 = vld [vmem:[#allocation16 + $0x48] sm:$0xff] }
 0x294   : > { %3287 = vmatpush3.bf16.msra.mxu0 %v3286_v21 }
 0x295   : > { %3288 = vmatprep.subr.bf16.mxu0 %v4122_v0 }
 0x296   : > { %3218 = vmatpush3.bf16.msra.mxu1 %v3217_v61  ;;  %v1033_v61 = vld [vmem:[#allocation10 + $0x28] sm:$0xff] }
 0x297   : > { %3219 = vmatprep.subr.bf16.mxu1 %v4122_v0  ;;  %v3268_v62 = vpack.c.bf16 %v1033_v61, %v1032_v60  ;;  %v1624_v60 = vld [vmem:[#allocation16 + $0x58] sm:$0xff] }
 0x298   : > { %3290 = vmatpush3.bf16.msra.mxu0 %v3289_v23 }
 0x299   : > { %3291 = vmatprep.subr.bf16.mxu0 %v4122_v0 }
 0x29a   : > { %3221 = vmatpush3.bf16.msra.mxu1 %v3220_v2 }
 0x29b   : > { %3222 = vmatprep.subr.bf16.mxu1 %v4122_v0 }
 0x29c   : > { %3293 = vmatpush3.bf16.msra.mxu0 %v3292_v26  ;;  %v1066_v26 = vld [vmem:[#allocation13 + $0x28] sm:$0xff] }
 0x29d   : > { %3294 = vmatprep.subr.bf16.mxu0 %v4122_v0  ;;  %v3316_v27 = vpack.c.bf16 %v1066_v26, %v1065_v25  ;;  %v1602_v25 = vld [vmem:[#allocation14 + $0x28] sm:$0xff] }
 0x29e   : > { %3224 = vmatpush3.bf16.msra.mxu1 %v3223_v5  ;;  %v3274_v5 = vpack.c.bf16 %v1037_v4, %v1036_v3  ;;  %v1628_v3 = vld [vmem:[#allocation16 + $0x78] sm:$0xff] }
 0x29f   : > { %3225 = vmatprep.subr.bf16.mxu1 %v4122_v0 }
 0x2a0   : > { %3296 = vmatpush3.bf16.msra.mxu0 %v3295_v29  ;;  %v1068_v29 = vld [vmem:[#allocation13 + $0x38] sm:$0xff] }
 0x2a1   : > { %3297 = vmatprep.subr.bf16.mxu0 %v4122_v0  ;;  %v3319_v30 = vpack.c.bf16 %v1068_v29, %v1067_v28  ;;  %v1604_v28 = vld [vmem:[#allocation14 + $0x38] sm:$0xff] }
 0x2a2   : > { %3227 = vmatpush3.bf16.msra.mxu1 %v3226_v8  ;;  %v3277_v8 = vpack.c.bf16 %v1039_v7, %v1038_v6 }
 0x2a3   : > { %3228 = vmatprep.subr.bf16.mxu1 %v4122_v0 }
 0x2a4   : > { %3299 = vmatpush3.bf16.msra.mxu0 %v3298_v32  ;;  %v1070_v32 = vld [vmem:[#allocation13 + $0x48] sm:$0xff] }
 0x2a5   : > { %3300 = vmatprep.subr.bf16.mxu0 %v4122_v0  ;;  %v3322_v33 = vpack.c.bf16 %v1070_v32, %v1069_v31  ;;  %v1606_v31 = vld [vmem:[#allocation14 + $0x48] sm:$0xff] }
 0x2a6   : > { %3230 = vmatpush3.bf16.msra.mxu1 %v3229_v11  ;;  %v3280_v11 = vpack.c.bf16 %v1041_v10, %v1040_v9  ;;  %v2526_v10 = vld [vmem:[%s5005_s28] ss:$0 sm:$0xff]  ;;  %s4872_s28 = scalar_lea.hbm %s5011_s7, %s2534_s0 }
 0x2a7   : > { %3231 = vmatprep.subr.bf16.mxu1 %v4122_v0 }
 0x2a8   : > { %3302 = vmatpush3.bf16.msra.mxu0 %v3301_v35  ;;  %v1072_v35 = vld [vmem:[#allocation13 + $0x58] sm:$0xff] }
 0x2a9   : > { %3303 = vmatprep.subr.bf16.mxu0 %v4122_v0 }
 0x2aa   : > { %3233 = vmatpush3.bf16.msra.mxu1 %v3232_v14  ;;  %v3283_v14 = vpack.c.bf16 %v1043_v13, %v1042_v12 }
 0x2ab   : > { %3234 = vmatprep.subr.bf16.mxu1 %v4122_v0 }
 0x2ac   : > { %3305 = vmatpush3.bf16.msra.mxu0 %v3304_v42  ;;  %v3331_v42 = vpack.c.bf16 %v1076_v41, %v1075_v40  ;;  %v1612_v40 = vld [vmem:[#allocation14 + $0x78] sm:$0xff] }
 0x2ad   : > { %3306 = vmatprep.subr.bf16.mxu0 %v4122_v0 }
 0x2ae   : > { %3236 = vmatpush3.bf16.msra.mxu1 %v3235_v17  ;;  %v3310_v17 = vpack.c.bf16 %v1062_v16, %v1061_v15  ;;  %v1597_v15 = vld [vmem:[#allocation14] sm:$0xff]  ;;  %v1598_v16 = vld [vmem:[#allocation14 + $0x8] sm:$0xff] }
 0x2af   : > { %2859 = vmatprep.subr.mxu1 %v4124_v1  ;;  %v3334_v20 = vpack.c.bf16 %v1598_v16, %v1597_v15 }
 0x2b0   : > { %3308 = vmatpush3.bf16.msra.mxu0 %v3307_v45  ;;  %v1615_v45 = vld [vmem:[#allocation16 + $0x10] sm:$0xff] }
 0x2b1   : > { %2969 = vmatprep.subr.mxu0 %v4124_v1 }
 0x363   : > { %v1288_v36 = vpop.f32.mrb[2].mxu0 }
 0x364   : > { %v1148_v37 = vpop.f32.mrb[0].mxu1  ;;  %v2858_v38 = vpop.f32.mrb[3].mxu0 }
 0x365   : > { %v2788_v39 = vpop.f32.mrb[1].mxu1  ;;  %2822 = vmatmul.mubr.f32.vlgmr.msra.gmra.mrb[2].mxu1 %v1148_v37  ;;  %v1073_v37 = vld [vmem:[#allocation13 + $0x60] sm:$0xff]  ;;  %v1074_v38 = vld [vmem:[#allocation13 + $0x68] sm:$0xff] }
 0x366   : > { %2861 = vmatprep.mubr.msk.f32.mxu1 %vm4123_vm0, %v4124_v1  ;;  %v3328_v39 = vpack.c.bf16 %v1074_v38, %v1073_v37  ;;  %v1610_v37 = vld [vmem:[#allocation14 + $0x68] sm:$0xff] }
 0x438   : > { %v1218_v47 = vpop.f32.mrb[2].mxu1 }
 0x439   : > { %v1289_v48 = vadd.f32 %v1288_v36, %v1218_v47  ;;  %v2823_v49 = vpop.f32.mrb[3].mxu1  ;;  %v3325_v36 = vpack.c.bf16 %v1072_v35, %v1071_v34  ;;  %v1616_v47 = vld [vmem:[#allocation16 + $0x18] sm:$0xff] }
 0x43a   : > { %v1617_v49 = vld [vmem:[#allocation16 + $0x20] sm:$0xff]  ;;  %v1608_v34 = vld [vmem:[#allocation14 + $0x58] sm:$0xff] }
 0x43b   : > { %v1298_v52 = vadd.f32 %v2523_v46, %v1289_v48  ;;  %v3358_v46 = vpack.c.bf16 %v1614_v44, %v1613_v43  ;;  %v3361_v48 = vpack.c.bf16 %v1616_v47, %v1615_v45  ;;  %v3364_v51 = vpack.c.bf16 %v1618_v50, %v1617_v49  ;;  %v1631_v47 = vld [vmem:[#allocation17 + $0x8] sm:$0xff]  ;;  %v1633_v50 = vld [vmem:[#allocation17 + $0x18] sm:$0xff] }
 0x43d   : > { %v1299_v53 = vmax.f32 %v1298_v52, 0.0  ;;  %v1619_v52 = vld [vmem:[#allocation16 + $0x30] sm:$0xff] }
 0x43f   : > { %2860 = vmatpush3.msra.mxu1 %v1299_v53  ;;  %2932 = vmatmul.mubr.f32.vlgmr.msra.gmra.mrb[4].mxu0 %v1299_v53 }
 0x440   : > { %2862 = vmatmul.mubr.msk.f32.vlgmr.msra.gmra.mrb[4].mxu1 %vm1078_vm1, %v4711_v57  ;;  %3261 = vmatprep.subr.bf16.mxu1 %v4122_v0  ;;  %v1035_v57 = vld [vmem:[#allocation10 + $0x38] sm:$0xff] }
 0x441   : > { %3263 = vmatpush3.bf16.msra.mxu1 %v3262_v54  ;;  %2896 = vmatprep.mubr.msk.f32.mxu1 %vm4123_vm0, %v4124_v1  ;;  %v3271_v2 = vpack.c.bf16 %v1035_v57, %v1034_v63  ;;  %v1621_v54 = vld [vmem:[#allocation16 + $0x40] sm:$0xff]  ;;  %v1626_v63 = vld [vmem:[#allocation16 + $0x68] sm:$0xff] }
 0x442   : > { %3264 = vmatprep.subr.bf16.mxu1 %v4122_v0  ;;  %2971 = vmatprep.mubr.msk.f32.mxu0 %vm4123_vm0, %v4124_v1  ;;  %v3370_v58 = vpack.c.bf16 %v1622_v56, %v1621_v54  ;;  %v1636_v54 = vld [vmem:[#allocation17 + $0x30] sm:$0xff]  ;;  %v1637_v56 = vld [vmem:[#allocation17 + $0x38] sm:$0xff] }
 0x445   : > { %3266 = vmatpush3.bf16.msra.mxu1 %v3265_v59  ;;  %v1623_v59 = vld [vmem:[#allocation16 + $0x50] sm:$0xff] }
 0x446   : > { %3267 = vmatprep.subr.bf16.mxu1 %v4122_v0  ;;  %v3373_v61 = vpack.c.bf16 %v1624_v60, %v1623_v59  ;;  %v1638_v59 = vld [vmem:[#allocation17 + $0x40] sm:$0xff]  ;;  %v1639_v60 = vld [vmem:[#allocation17 + $0x48] sm:$0xff] }
 0x449   : > { %3269 = vmatpush3.bf16.msra.mxu1 %v3268_v62  ;;  %v1625_v62 = vld [vmem:[#allocation16 + $0x60] sm:$0xff] }
 0x44a   : > { %3270 = vmatprep.subr.bf16.mxu1 %v4122_v0  ;;  %v3376_v57 = vpack.c.bf16 %v1626_v63, %v1625_v62  ;;  %v1640_v62 = vld [vmem:[#allocation17 + $0x50] sm:$0xff]  ;;  %v1641_v63 = vld [vmem:[#allocation17 + $0x58] sm:$0xff] }
 0x44d   : > { %3272 = vmatpush3.bf16.msra.mxu1 %v3271_v2  ;;  %v1627_v2 = vld [vmem:[#allocation16 + $0x70] sm:$0xff] }
 0x44e   : > { %3273 = vmatprep.subr.bf16.mxu1 %v4122_v0  ;;  %v3379_v4 = vpack.c.bf16 %v1628_v3, %v1627_v2  ;;  %v1642_v2 = vld [vmem:[#allocation17 + $0x60] sm:$0xff]  ;;  %v1643_v3 = vld [vmem:[#allocation17 + $0x68] sm:$0xff] }
 0x451   : > { %3275 = vmatpush3.bf16.msra.mxu1 %v3274_v5 }
 0x452   : > { %3276 = vmatprep.subr.bf16.mxu1 %v4122_v0 }
 0x455   : > { %3278 = vmatpush3.bf16.msra.mxu1 %v3277_v8  ;;  %v2525_v8 = vld [vmem:[%s5004_s22] ss:$0 sm:$0xff] }
 0x456   : > { %3279 = vmatprep.subr.bf16.mxu1 %v4122_v0 }
 0x459   : > { %3281 = vmatpush3.bf16.msra.mxu1 %v3280_v11 }
 0x45a   : > { %3282 = vmatprep.subr.bf16.mxu1 %v4122_v0 }
 0x45d   : > { %3284 = vmatpush3.bf16.msra.mxu1 %v3283_v14 }
 0x45e   : > { %3309 = vmatprep.subr.bf16.mxu1 %v4122_v0 }
 0x512   : > { %v4758_v18 = vpop.f32.mrb[4].mxu0 }
 0x513   : > { %v1366_v21 = vpop.f32.mrb[4].mxu1  ;;  %v2933_v22 = vpop.f32.mrb[5].mxu0 }
 0x514   : > { %v2863_v23 = vpop.f32.mrb[5].mxu1  ;;  %2897 = vmatmul.mubr.f32.vlgmr.msra.gmra.mrb[6].mxu1 %v1366_v21  ;;  %v1599_v21 = vld [vmem:[#allocation14 + $0x10] sm:$0xff]  ;;  %v1600_v22 = vld [vmem:[#allocation14 + $0x18] sm:$0xff] }
 0x515   : > { %3311 = vmatpush3.bf16.msra.mxu1 %v3310_v17  ;;  %2966 = vmatprep.mubr.msk.f32.mxu1 %vm4123_vm0, %v4124_v1  ;;  %v3337_v23 = vpack.c.bf16 %v1600_v22, %v1599_v21  ;;  %v1650_v22 = vld [vmem:[#allocation19 + $0x20] sm:$0xff] }
 0x516   : > { %3312 = vmatprep.subr.bf16.mxu1 %v4122_v0 }
 0x519   : > { %3314 = vmatpush3.bf16.msra.mxu1 %v3313_v24  ;;  %v1601_v24 = vld [vmem:[#allocation14 + $0x20] sm:$0xff] }
 0x51a   : > { %3315 = vmatprep.subr.bf16.mxu1 %v4122_v0  ;;  %v3340_v26 = vpack.c.bf16 %v1602_v25, %v1601_v24  ;;  %v1652_v25 = vld [vmem:[#allocation19 + $0x30] sm:$0xff] }
 0x51d   : > { %3317 = vmatpush3.bf16.msra.mxu1 %v3316_v27  ;;  %v1603_v27 = vld [vmem:[#allocation14 + $0x30] sm:$0xff] }
 0x51e   : > { %3318 = vmatprep.subr.bf16.mxu1 %v4122_v0  ;;  %v3343_v29 = vpack.c.bf16 %v1604_v28, %v1603_v27  ;;  %v1655_v28 = vld [vmem:[#allocation19 + $0x48] sm:$0xff] }
 0x521   : > { %3320 = vmatpush3.bf16.msra.mxu1 %v3319_v30  ;;  %v1605_v30 = vld [vmem:[#allocation14 + $0x40] sm:$0xff] }
 0x522   : > { %3321 = vmatprep.subr.bf16.mxu1 %v4122_v0  ;;  %v3346_v32 = vpack.c.bf16 %v1606_v31, %v1605_v30  ;;  %v1656_v30 = vld [vmem:[#allocation19 + $0x50] sm:$0xff]  ;;  %v1657_v31 = vld [vmem:[#allocation19 + $0x58] sm:$0xff] }
 0x525   : > { %3323 = vmatpush3.bf16.msra.mxu1 %v3322_v33  ;;  %v1607_v33 = vld [vmem:[#allocation14 + $0x50] sm:$0xff] }
 0x526   : > { %3324 = vmatprep.subr.bf16.mxu1 %v4122_v0  ;;  %v3349_v35 = vpack.c.bf16 %v1608_v34, %v1607_v33  ;;  %v1658_v33 = vld [vmem:[#allocation19 + $0x60] sm:$0xff]  ;;  %v1659_v34 = vld [vmem:[#allocation19 + $0x68] sm:$0xff] }
 0x529   : > { %3326 = vmatpush3.bf16.msra.mxu1 %v3325_v36  ;;  %v1609_v36 = vld [vmem:[#allocation14 + $0x60] sm:$0xff] }
 0x52a   : > { %3327 = vmatprep.subr.bf16.mxu1 %v4122_v0  ;;  %v3352_v38 = vpack.c.bf16 %v1610_v37, %v1609_v36  ;;  %v1660_v36 = vld [vmem:[#allocation19 + $0x70] sm:$0xff]  ;;  %v1661_v37 = vld [vmem:[#allocation19 + $0x78] sm:$0xff] }
 0x52d   : > { %3329 = vmatpush3.bf16.msra.mxu1 %v3328_v39  ;;  %v1611_v39 = vld [vmem:[#allocation14 + $0x70] sm:$0xff] }
 0x52e   : > { %3330 = vmatprep.subr.bf16.mxu1 %v4122_v0  ;;  %v3355_v41 = vpack.c.bf16 %v1612_v40, %v1611_v39  ;;  %v1663_v39 = vld [vmem:[#allocation20] sm:$0xff]  ;;  %v1664_v40 = vld [vmem:[#allocation20 + $0x8] sm:$0xff] }
 0x531   : > { %3332 = vmatpush3.bf16.msra.mxu1 %v3331_v42 }
 0x532   : > { %3357 = vmatprep.subr.bf16.mxu1 %v4122_v0 }
 0x534   : > { %2967 = vmatmul.mubr.f32.vlgmr.msra.gmra.mrb[8].mxu1 %v4706_v55  ;;  %v1620_v55 = vld [vmem:[#allocation16 + $0x38] sm:$0xff] }
 0x535   : > { %3041 = vmatprep.mubr.msk.f32.mxu1 %vm4123_vm0, %v4124_v1  ;;  %3359 = vmatpush3.bf16.msra.mxu1 %v3358_v46  ;;  %v3367_v53 = vpack.c.bf16 %v1620_v55, %v1619_v52  ;;  %v1630_v46 = vld [vmem:[#allocation17] sm:$0xff]  ;;  %v1635_v55 = vld [vmem:[#allocation17 + $0x28] sm:$0xff] }
 0x536   : > { %3360 = vmatprep.subr.bf16.mxu1 %v4122_v0  ;;  %v3382_v49 = vpack.c.bf16 %v1631_v47, %v1630_v46  ;;  %v1634_v52 = vld [vmem:[#allocation17 + $0x20] sm:$0xff] }
 0x537   : > { %v1667_v47 = vld [vmem:[#allocation20 + $0x20] sm:$0xff] }
 0x539   : > { %3362 = vmatpush3.bf16.msra.mxu1 %v3361_v48  ;;  %v1632_v48 = vld [vmem:[#allocation17 + $0x10] sm:$0xff] }
 0x53a   : > { %3363 = vmatprep.subr.bf16.mxu1 %v4122_v0 }
 0x53d   : > { %3365 = vmatpush3.bf16.msra.mxu1 %v3364_v51  ;;  %v3385_v51 = vpack.c.bf16 %v1633_v50, %v1632_v48  ;;  %v1668_v48 = vld [vmem:[#allocation20 + $0x28] sm:$0xff]  ;;  %v1669_v50 = vld [vmem:[#allocation20 + $0x30] sm:$0xff] }
 0x53e   : > { %3366 = vmatprep.subr.bf16.mxu1 %v4122_v0 }
 0x541   : > { %3368 = vmatpush3.bf16.msra.mxu1 %v3367_v53  ;;  %v3388_v53 = vpack.c.bf16 %v1635_v55, %v1634_v52  ;;  %v1671_v55 = vld [vmem:[#allocation20 + $0x40] sm:$0xff] }
 0x542   : > { %3369 = vmatprep.subr.bf16.mxu1 %v4122_v0 }
 0x545   : > { %3371 = vmatpush3.bf16.msra.mxu1 %v3370_v58  ;;  %v3391_v58 = vpack.c.bf16 %v1637_v56, %v1636_v54  ;;  %v1674_v56 = vld [vmem:[#allocation20 + $0x58] sm:$0xff] }
 0x546   : > { %3372 = vmatprep.subr.bf16.mxu1 %v4122_v0 }
 0x549   : > { %3374 = vmatpush3.bf16.msra.mxu1 %v3373_v61  ;;  %v3394_v61 = vpack.c.bf16 %v1639_v60, %v1638_v59  ;;  %v1675_v59 = vld [vmem:[#allocation20 + $0x60] sm:$0xff]  ;;  %v1676_v60 = vld [vmem:[#allocation20 + $0x68] sm:$0xff] }
 0x54a   : > { %3375 = vmatprep.subr.bf16.mxu1 %v4122_v0 }
 0x54d   : > { %3377 = vmatpush3.bf16.msra.mxu1 %v3376_v57  ;;  %v3397_v57 = vpack.c.bf16 %v1641_v63, %v1640_v62  ;;  %v1677_v62 = vld [vmem:[#allocation20 + $0x70] sm:$0xff]  ;;  %v1678_v63 = vld [vmem:[#allocation20 + $0x78] sm:$0xff] }
 0x54e   : > { %3378 = vmatprep.subr.bf16.mxu1 %v4122_v0 }
 0x551   : > { %3380 = vmatpush3.bf16.msra.mxu1 %v3379_v4  ;;  %v3400_v4 = vpack.c.bf16 %v1643_v3, %v1642_v2 }
 0x552   : > { %3381 = vmatprep.subr.bf16.mxu1 %v4122_v0 }
 0x5e7   : > { %v1436_v5 = vpop.f32.mrb[6].mxu1 }
 0x5e8   : > { %v1507_v6 = vadd.f32 %v4758_v18, %v1436_v5  ;;  %v2898_v7 = vpop.f32.mrb[7].mxu1  ;;  %v4793_v18 = vld [vmem:[%s5006_s27] sm:$0xff] }
 0x5e9   : > { %v1644_v5 = vld [vmem:[#allocation17 + $0x70] sm:$0xff] }
 0x5ea   : > { %v1516_v9 = vadd.f32 %v2525_v8, %v1507_v6  ;;  %v1645_v6 = vld [vmem:[#allocation17 + $0x78] sm:$0xff]  ;;  %v2528_v8 = vld [vmem:[%s5007_s9] ss:$0 sm:$0xff]  ;;  %s899_s9 = scalar_lea.vmem [#allocation23], %s2507_s3  ;;  %s4019_s3 = sshll.u32 %s4125_s26, 4  ;;  %s4020_s3 = int_to_ptr.vmem [resolvable:$false] %s4019_s3 }
 0x5eb   : > { %v3403_v7 = vpack.c.bf16 %v1645_v6, %v1644_v5  ;;  %v2198_v5 = vld [vmem:[#allocation22 + $0x8] sm:$0xff]  ;;  %v2199_v6 = vld [vmem:[#allocation22 + $0x10] sm:$0xff]  ;;  %s2305_s18 = sshll.u32 %s899_s9, 4  ;;  %s4021_s27 = scalar_lea.vmem %s4020_s3, 256  ;;  %s4874_s18 = int_to_ptr.vmem [resolvable:$true] %s2305_s18 }
 0x5ec   : > { %v1517_v12 = vmax.f32 %v1516_v9, 0.0  ;;  %s4015_s13 = scalar_lea.vmem %s4874_s18, 128  ;;  %p4022_p11 = scmp.lt.s32.totalorder %s4874_s18, %s4020_s3 }
 0x5ed   : > { %p4016_p2 = scmp.ne.s32.totalorder %s4874_s18, %s4015_s13  ;;  %p4023_p8 = scmp.lt.s32.totalorder %s4021_s27, %s4015_s13 }
 0x5ef   : > { %p4017_p4 = pnand %p4016_p2, %p5012_p3  ;;  %p4024_p5 = por %p4023_p8, %p4022_p11 }
 0x5f1   : > { %p4018_p10 = pneg %p4017_p4 }
 0x5f3   : > { %p4025_p7 = pnand %p4024_p5, %p4018_p10 }
 0x607   : > { %v1590_v11 = vpop.f32.mrb[8].mxu1 }
 0x608   : > { %v1591_v13 = vadd.f32 %v2526_v10, %v1590_v11  ;;  %v2968_v14 = vpop.f32.mrb[9].mxu1 }
 0x60a   : > { %v1594_v17 = vadd.f32 %v1591_v13, %v1517_v12  ;;  %v1646_v12 = vld [vmem:[#allocation19] sm:$0xff]  ;;  %v1647_v13 = vld [vmem:[#allocation19 + $0x8] sm:$0xff] }
 0x60b   : > { %v3406_v16 = vpack.c.bf16 %v1647_v13, %v1646_v12  ;;  %v2203_v13 = vld [vmem:[#allocation22 + $0x30] sm:$0xff] }
 0x60c   : > { %v4788_v19 = vmax.f32 %v1594_v17, 0.0  ;;  %v1648_v17 = vld [vmem:[#allocation19 + $0x10] sm:$0xff] }
 0x60e   : > { %2970 = vmatpush3.msra.mxu0 %v4788_v19  ;;  %3042 = vmatmul.mubr.f32.vlgmr.msra.gmra.mrb[10].mxu1 %v4788_v19 }
 0x60f   : > { %2972 = vmatmul.mubr.msk.f32.vlgmr.msra.gmra.mrb[6].mxu0 %vm1078_vm1, %v4793_v18  ;;  %3333 = vmatprep.subr.bf16.mxu0 %v4122_v0 }
 0x610   : > { %3335 = vmatpush3.bf16.msra.mxu0 %v3334_v20  ;;  %3006 = vmatprep.mubr.msk.f32.mxu0 %vm4123_vm0, %v4124_v1  ;;  %v1649_v20 = vld [vmem:[#allocation19 + $0x18] sm:$0xff] }
 0x611   : > { %3336 = vmatprep.subr.bf16.mxu0 %v4122_v0  ;;  %3081 = vmatprep.mubr.msk.f32.mxu1 %vm4123_vm0, %v4124_v1  ;;  %v3409_v21 = vpack.c.bf16 %v1649_v20, %v1648_v17  ;;  %v2207_v20 = vld [vmem:[#allocation22 + $0x50] sm:$0xff] }
 0x612   : > { %3383 = vmatpush3.bf16.msra.mxu1 %v3382_v49  ;;  %v3436_v49 = vpack.c.bf16 %v1668_v48, %v1667_v47 }
 0x613   : > { %3384 = vmatprep.subr.bf16.mxu1 %v4122_v0 }
 0x614   : > { %3338 = vmatpush3.bf16.msra.mxu0 %v3337_v23  ;;  %v1651_v23 = vld [vmem:[#allocation19 + $0x28] sm:$0xff] }
 0x615   : > { %3339 = vmatprep.subr.bf16.mxu0 %v4122_v0  ;;  %v3412_v24 = vpack.c.bf16 %v1651_v23, %v1650_v22  ;;  %v2209_v23 = vld [vmem:[#allocation22 + $0x60] sm:$0xff] }
 0x616   : > { %3386 = vmatpush3.bf16.msra.mxu1 %v3385_v51  ;;  %v1670_v51 = vld [vmem:[#allocation20 + $0x38] sm:$0xff] }
 0x617   : > { %3387 = vmatprep.subr.bf16.mxu1 %v4122_v0  ;;  %v3439_v52 = vpack.c.bf16 %v1670_v51, %v1669_v50 }
 0x618   : > { %3341 = vmatpush3.bf16.msra.mxu0 %v3340_v26  ;;  %v1653_v26 = vld [vmem:[#allocation19 + $0x38] sm:$0xff] }
 0x619   : > { %3342 = vmatprep.subr.bf16.mxu0 %v4122_v0  ;;  %v3415_v27 = vpack.c.bf16 %v1653_v26, %v1652_v25  ;;  %v2211_v26 = vld [vmem:[#allocation22 + $0x70] sm:$0xff] }
 0x61a   : > { %3389 = vmatpush3.bf16.msra.mxu1 %v3388_v53  ;;  %v1672_v53 = vld [vmem:[#allocation20 + $0x48] sm:$0xff] }
 0x61b   : > { %3390 = vmatprep.subr.bf16.mxu1 %v4122_v0  ;;  %v3442_v54 = vpack.c.bf16 %v1672_v53, %v1671_v55 }
 0x61c   : > { %3344 = vmatpush3.bf16.msra.mxu0 %v3343_v29 }
 0x61d   : > { %3345 = vmatprep.subr.bf16.mxu0 %v4122_v0 }
 0x61e   : > { %3392 = vmatpush3.bf16.msra.mxu1 %v3391_v58 }
 0x61f   : > { %3393 = vmatprep.subr.bf16.mxu1 %v4122_v0 }
 0x620   : > { %3347 = vmatpush3.bf16.msra.mxu0 %v3346_v32  ;;  %v3421_v32 = vpack.c.bf16 %v1657_v31, %v1656_v30  ;;  %v2530_v31 = vld [vmem:[%s5008_s11] ss:$0 sm:$0xff] }
 0x621   : > { %3348 = vmatprep.subr.bf16.mxu0 %v4122_v0 }
 0x622   : > { %3395 = vmatpush3.bf16.msra.mxu1 %v3394_v61  ;;  %v3448_v61 = vpack.c.bf16 %v1676_v60, %v1675_v59 }
 0x623   : > { %3396 = vmatprep.subr.bf16.mxu1 %v4122_v0 }
 0x624   : > { %3350 = vmatpush3.bf16.msra.mxu0 %v3349_v35  ;;  %v3424_v35 = vpack.c.bf16 %v1659_v34, %v1658_v33  ;;  %v2531_v33 = vld [vmem:[%s5009_s2] ss:$0 sm:$0xff]  ;;  %s2292_s2 = scalar_lea.sflag [#allocation4], %s4642_s23 }
 0x625   : > { %3351 = vmatprep.subr.bf16.mxu0 %v4122_v0 }
 0x626   : > { %3398 = vmatpush3.bf16.msra.mxu1 %v3397_v57  ;;  %v3451_v57 = vpack.c.bf16 %v1678_v63, %v1677_v62 }
 0x627   : > { %3399 = vmatprep.subr.bf16.mxu1 %v4122_v0 }
 0x628   : > { %3353 = vmatpush3.bf16.msra.mxu0 %v3352_v38  ;;  %v3427_v38 = vpack.c.bf16 %v1661_v37, %v1660_v36 }
 0x629   : > { %3354 = vmatprep.subr.bf16.mxu0 %v4122_v0 }
 0x62a   : > { %3401 = vmatpush3.bf16.msra.mxu1 %v3400_v4  ;;  %v2197_v4 = vld [vmem:[#allocation22] sm:$0xff] }
 0x62b   : > { %3402 = vmatprep.subr.bf16.mxu1 %v4122_v0 }
 0x62c   : > { %3356 = vmatpush3.bf16.msra.mxu0 %v3355_v41  ;;  %v3430_v41 = vpack.c.bf16 %v1664_v40, %v1663_v39  ;;  %v2532_v39 = vld [vmem:[%s5010_s12] ss:$0 sm:$0xff] }
 0x62d   : > { %3044 = vmatprep.subr.mxu0 %v4124_v1 }
 0x62e   : > { %3404 = vmatpush3.bf16.msra.mxu1 %v3403_v7  ;;  %v3454_v7 = vpack.c.bf16 %v2198_v5, %v2197_v4 }
 0x62f   : > { %3429 = vmatprep.subr.bf16.mxu1 %v4122_v0 }
 0x6e1   : > { %v1889_v42 = vpop.f32.mrb[10].mxu1 }
 0x6e2   : > { %v1749_v43 = vpop.f32.mrb[6].mxu0  ;;  %v3043_v44 = vpop.f32.mrb[11].mxu1 }
 0x6e3   : > { %v2973_v45 = vpop.f32.mrb[7].mxu0  ;;  %3007 = vmatmul.mubr.f32.vlgmr.msra.gmra.mrb[8].mxu0 %v1749_v43  ;;  %v1666_v43 = vld [vmem:[#allocation20 + $0x18] sm:$0xff] }
 0x6e4   : > { %3046 = vmatprep.mubr.msk.f32.mxu0 %vm4123_vm0, %v4124_v1 }
 0x7b6   : > { %v1819_v9 = vpop.f32.mrb[8].mxu0 }
 0x7b7   : > { %v1890_v10 = vadd.f32 %v1889_v42, %v1819_v9  ;;  %v3008_v11 = vpop.f32.mrb[9].mxu0  ;;  %v1665_v42 = vld [vmem:[#allocation20 + $0x10] sm:$0xff] }
 0x7b8   : > { %v3433_v46 = vpack.c.bf16 %v1666_v43, %v1665_v42  ;;  %v2202_v11 = vld [vmem:[#allocation22 + $0x28] sm:$0xff] }
 0x7b9   : > { %v1899_v14 = vadd.f32 %v2528_v8, %v1890_v10  ;;  %v2200_v8 = vld [vmem:[#allocation22 + $0x18] sm:$0xff]  ;;  %v2201_v10 = vld [vmem:[#allocation22 + $0x20] sm:$0xff] }
 0x7ba   : > { %v3457_v9 = vpack.c.bf16 %v2200_v8, %v2199_v6  ;;  %v3460_v12 = vpack.c.bf16 %v2202_v11, %v2201_v10 }
 0x7bb   : > { %v1900_v15 = vmax.f32 %v1899_v14, 0.0  ;;  %v2204_v14 = vld [vmem:[#allocation22 + $0x38] sm:$0xff] }
 0x7bd   : > { %3045 = vmatpush3.msra.mxu0 %v1900_v15 }
 0x7be   : > { %3047 = vmatmul.mubr.msk.f32.vlgmr.msra.gmra.mrb[10].mxu0 %vm1078_vm1, %v4793_v18  ;;  %3405 = vmatprep.subr.bf16.mxu0 %v4122_v0  ;;  %v1654_v18 = vld [vmem:[#allocation19 + $0x40] sm:$0xff] }
 0x7bf   : > { %3407 = vmatpush3.bf16.msra.mxu0 %v3406_v16  ;;  %3116 = vmatprep.mubr.msk.f32.mxu0 %vm4123_vm0, %v4124_v1  ;;  %v3418_v29 = vpack.c.bf16 %v1655_v28, %v1654_v18  ;;  %v2206_v16 = vld [vmem:[#allocation22 + $0x48] sm:$0xff] }
 0x7c0   : > { %3408 = vmatprep.subr.bf16.mxu0 %v4122_v0 }
 0x7c3   : > { %3410 = vmatpush3.bf16.msra.mxu0 %v3409_v21  ;;  %v2208_v21 = vld [vmem:[#allocation22 + $0x58] sm:$0xff] }
 0x7c4   : > { %3411 = vmatprep.subr.bf16.mxu0 %v4122_v0  ;;  %v3469_v22 = vpack.c.bf16 %v2208_v21, %v2207_v20 }
 0x7c7   : > { %3413 = vmatpush3.bf16.msra.mxu0 %v3412_v24  ;;  %v2210_v24 = vld [vmem:[#allocation22 + $0x68] sm:$0xff] }
 0x7c8   : > { %3414 = vmatprep.subr.bf16.mxu0 %v4122_v0  ;;  %v3472_v25 = vpack.c.bf16 %v2210_v24, %v2209_v23 }
 0x7cb   : > { %3416 = vmatpush3.bf16.msra.mxu0 %v3415_v27  ;;  %v2212_v27 = vld [vmem:[#allocation22 + $0x78] sm:$0xff] }
 0x7cc   : > { %3417 = vmatprep.subr.bf16.mxu0 %v4122_v0  ;;  %v3475_v18 = vpack.c.bf16 %v2212_v27, %v2211_v26 }
 0x7cf   : > { %3419 = vmatpush3.bf16.msra.mxu0 %v3418_v29 }
 0x7d0   : > { %3420 = vmatprep.subr.bf16.mxu0 %v4122_v0 }
 0x7d3   : > { %3422 = vmatpush3.bf16.msra.mxu0 %v3421_v32 }
 0x7d4   : > { %3423 = vmatprep.subr.bf16.mxu0 %v4122_v0 }
 0x7d7   : > { %3425 = vmatpush3.bf16.msra.mxu0 %v3424_v35 }
 0x7d8   : > { %3426 = vmatprep.subr.bf16.mxu0 %v4122_v0 }
 0x7db   : > { %3428 = vmatpush3.bf16.msra.mxu0 %v3427_v38 }
 0x7dc   : > { %3453 = vmatprep.subr.bf16.mxu0 %v4122_v0 }
 0x7de   : > { %3117 = vmatmul.mubr.f32.vlgmr.msra.gmra.mrb[12].mxu0 %v1900_v15  ;;  %v2205_v15 = vld [vmem:[#allocation22 + $0x40] sm:$0xff] }
 0x7df   : > { %3186 = vmatprep.mubr.msk.f32.mxu0 %vm4123_vm0, %v4124_v1  ;;  %3455 = vmatpush3.bf16.msra.mxu0 %v3454_v7  ;;  %v3466_v17 = vpack.c.bf16 %v2206_v16, %v2205_v15 }
 0x7e0   : > { %3456 = vmatprep.subr.bf16.mxu0 %v4122_v0 }
 0x7e3   : > { %3458 = vmatpush3.bf16.msra.mxu0 %v3457_v9 }
 0x7e4   : > { %3459 = vmatprep.subr.bf16.mxu0 %v4122_v0 }
 0x7e7   : > { %3461 = vmatpush3.bf16.msra.mxu0 %v3460_v12 }
 0x7e8   : > { %3462 = vmatprep.subr.bf16.mxu0 %v4122_v0 }
 0x891   : > { %v1967_v44 = vpop.f32.mrb[10].mxu0 }
 0x892   : > { %3082 = vmatmul.mubr.f32.vlgmr.msra.gmra.mrb[12].mxu1 %v1967_v44  ;;  %v3048_v45 = vpop.f32.mrb[11].mxu0 }
 0x893   : > { %3431 = vmatpush3.bf16.msra.mxu1 %v3430_v41  ;;  %3151 = vmatprep.mubr.msk.f32.mxu1 %vm4123_vm0, %v4124_v1  ;;  %v1673_v1 = vld [vmem:[#allocation20 + $0x50] sm:$0xff] }
 0x894   : > { %3432 = vmatprep.subr.bf16.mxu1 %v4122_v0  ;;  %v3445_v58 = vpack.c.bf16 %v1674_v56, %v1673_v1 }
 0x897   : > { %3434 = vmatpush3.bf16.msra.mxu1 %v3433_v46 }
 0x898   : > { %3435 = vmatprep.subr.bf16.mxu1 %v4122_v0 }
 0x89b   : > { %3437 = vmatpush3.bf16.msra.mxu1 %v3436_v49 }
 0x89c   : > { %3438 = vmatprep.subr.bf16.mxu1 %v4122_v0 }
 0x89f   : > { %3440 = vmatpush3.bf16.msra.mxu1 %v3439_v52 }
 0x8a0   : > { %3441 = vmatprep.subr.bf16.mxu1 %v4122_v0 }
 0x8a3   : > { %3443 = vmatpush3.bf16.msra.mxu1 %v3442_v54 }
 0x8a4   : > { %3444 = vmatprep.subr.bf16.mxu1 %v4122_v0 }
 0x8a7   : > { %3446 = vmatpush3.bf16.msra.mxu1 %v3445_v58 }
 0x8a8   : > { %3447 = vmatprep.subr.bf16.mxu1 %v4122_v0 }
 0x8ab   : > { %3449 = vmatpush3.bf16.msra.mxu1 %v3448_v61 }
 0x8ac   : > { %3450 = vmatprep.subr.bf16.mxu1 %v4122_v0 }
 0x8af   : > { %3452 = vmatpush3.bf16.msra.mxu1 %v3451_v57 }
 0x8b1   : > { %v2107_v2 = vpop.f32.mrb[12].mxu0 }
 0x8b2   : > { %3152 = vmatmul.mubr.f32.vlgmr.msra.gmra.mrb[14].mxu1 %v4788_v19  ;;  %v3118_v3 = vpop.f32.mrb[13].mxu0  ;;  %v3463_v19 = vpack.c.bf16 %v2204_v14, %v2203_v13 }
 0x8b4   : > { %3464 = vmatpush3.bf16.msra.mxu0 %v3463_v19 }
 0x8b5   : > { %3465 = vmatprep.subr.bf16.mxu0 %v4122_v0 }
 0x8b8   : > { %3467 = vmatpush3.bf16.msra.mxu0 %v3466_v17 }
 0x8b9   : > { %3468 = vmatprep.subr.bf16.mxu0 %v4122_v0 }
 0x8bc   : > { %3470 = vmatpush3.bf16.msra.mxu0 %v3469_v22 }
 0x8bd   : > { %3471 = vmatprep.subr.bf16.mxu0 %v4122_v0 }
 0x8c0   : > { %3473 = vmatpush3.bf16.msra.mxu0 %v3472_v25 }
 0x8c1   : > { %3474 = vmatprep.subr.bf16.mxu0 %v4122_v0 }
 0x8c4   : > { %3476 = vmatpush3.bf16.msra.mxu0 %v3475_v18 }
 0x965   : > { %v2037_v28 = vpop.f32.mrb[12].mxu1 }
 0x966   : > { %v2108_v29 = vadd.f32 %v2107_v2, %v2037_v28  ;;  %v3083_v30 = vpop.f32.mrb[13].mxu1 }
 0x968   : > { %v2117_v32 = vadd.f32 %v2530_v31, %v2108_v29 }
 0x96a   : > { %v2118_v0 = vmax.f32 %v2117_v32, 0.0 }
 0x985   : > { %v2191_v34 = vpop.f32.mrb[14].mxu1 }
 0x986   : > { %v2192_v35 = vadd.f32 %v2531_v33, %v2191_v34  ;;  %v3153_v36 = vpop.f32.mrb[15].mxu1 }
 0x988   : > { %v2195_v37 = vadd.f32 %v2192_v35, %v2118_v0 }
 0x98a   : > { %v2196_v38 = vmax.f32 %v2195_v37, 0.0 }
 0x98c   : > { %3187 = vmatmul.mubr.f32.vlgmr.msra.gmra.mrb[14].mxu0 %v2196_v38 }
 0xa5f   : > { %v2286_v40 = vpop.f32.mrb[14].mxu0 }
 0xa60   : > { %v2287_v41 = vadd.f32 %v2532_v39, %v2286_v40  ;;  %v3188_v42 = vpop.f32.mrb[15].mxu0 }
 0xa62   : > { %2290 = vst [vmem:[%s899_s9] sm:$0xff] %v2287_v41 }
 0xa63   : > { %4028 = shalt.err (!%p4025_p7)
}
 0xa64   : > { %s4029_s23 = scalar_lea.hbm %s4872_s28, 128  ;;  %s4033_s9 = scalar_lea.hbm %s5011_s7, 256 }
 0xa65   : > { %p4030_p6 = scmp.ne.s32.totalorder %s4872_s28, %s4029_s23  ;;  %p4034_p1 = scmp.lt.u32.totalorder %s4872_s28, %s5011_s7 }
 0xa66   : > { %p4035_p13 = scmp.lt.u32.totalorder %s4033_s9, %s4029_s23  ;;  %p4037_p2 = scmp.lt.u32.totalorder %s4029_s23, %s4872_s28 }
 0xa67   : > { %p4031_p9 = pnand %p4030_p6, %p5012_p3 }
 0xa68   : > { %p4036_p0 = por %p4035_p13, %p4034_p1 }
 0xa69   : > { %p4032_p12 = pneg %p4031_p9 }
 0xa6a   : > { %p4038_p4 = por %p4037_p2, %p4036_p0 }
 0xa6c   : > { %p4039_p10 = pnand %p4038_p4, %p4032_p12 }
 0xa6e   : > { %4042 = shalt.err (!%p4039_p10)
}
 0xa6f   : > { %3527 = dma.vmem_to_hbm [thread:$0]  (%p5012_p3), %s4874_s18, 128, %s4872_s28, %s2292_s2  }
 0xa70 PF: > { %s2317_s13 = sand.u32 1, %s4093_s4   ;;  %p5013_p11 = scmp.ne.s32.totalorder %s4984_s20, 0 }
 0xa71   : > { %p5014_p8 = scmp.ge.s32.totalorder %s4105_s25, 2  ;;  %s2318_s26 = scalar_lea.sflag [#allocation4], %s2317_s13 }
 0xa73   : > { %p3571_p5 = pnand %p5014_p8, %p5013_p11 }
 0xa75   : > { %4088 = dma.done.wait (!%p3571_p5), %s2318_s26, 128  }
 0xa76   : > { %4090 = vsyncadd (!%p3571_p5), %s2318_s26, 4294967168  ;;  %p42_p7 = scmp.ge.s32.totalorder %s4566_s6, 4   ;;  %s5015_s4 = smov %s4097_s30 }
 0xa77   : > { %s5016_s30 = smov %s4101_s24  ;;  %s5017_s24 = smov %s4577_s29 }
 0xa78   : > { %s5018_s25 = smov %s4566_s6  ;;  %44 = sbr.rel (!%p42_p7) target bundleno = 30 (0x1e), region = 205 }
 0xa7f   :  { %2323 = vsyncpa [#allocation3], 1 }
 0xa80   :  { %2325 = vsyncpa [#allocation3 + $0x1], 1 }
 0xa81   :  { %2326 = vsyncpa [#allocation6], 1 }
 0xa82   :  { %2327 = vsyncpa [#allocation9], 1 }
 0xa83   :  { %2328 = vsyncpa [#allocation12], 1 }
 0xa84   :  { %2329 = vsyncpa [#allocation15], 1 }
 0xa85   :  { %2330 = vsyncpa [#allocation18], 1 }
 0xa86   :  { %2331 = vsyncpa [#allocation21], 1 }
 0xa87   :  { %2332 = vsyncpa [#allocation4], 1 }
 0xa88   :  { %2334 = vsyncpa [#allocation4 + $0x1], 1 }

</bundles_post_ra>
